<compile_context>
chip_gen: v6e
topology: v6e:2x2x1
jax: 0.10.0
libtpu: 0.0.40
codegen_flags: <defaults>
</compile_context>

<pallas_src>
import functools

import jax
import jax.numpy as jnp
from jax.experimental import pallas as pl
from jax.experimental.pallas import tpu as pltpu


# ----------------------------- pallas plumbing ------------------------------

def _full_spec(shape):
    nd = len(shape)
    return pl.BlockSpec(shape, lambda i, _nd=nd: (0,) * _nd)


def _call(kernel, out_shapes, *arrays):
    """Single-invocation pallas_call with whole-array (exact, unpadded) blocks."""
    single = not isinstance(out_shapes, (tuple, list))
    outs = (out_shapes,) if single else tuple(out_shapes)
    res = pl.pallas_call(
        kernel,
        out_shape=outs,
        grid=(1,),
        in_specs=[_full_spec(a.shape) for a in arrays],
        out_specs=tuple(_full_spec(o.shape) for o in outs),
        compiler_params=pltpu.CompilerParams(dimension_semantics=("arbitrary",)),
    )(*arrays)
    return res[0] if single else res


# ------------------------------ fused kernels --------------------------------

def _conv_bn_lrelu_kernel(p_ref, w_ref, b_ref, g_ref, bt_ref, o_ref, *, eps, slope):
    """y^T = W(Cout,9Cin) @ P(9Cin,M)  + bias, then train-mode BN + LeakyReLU."""
    acc = jnp.dot(w_ref[...], p_ref[...], preferred_element_type=jnp.float32)
    acc = acc + b_ref[...]                                   # (Cout, M)
    n = float(acc.shape[1])
    mean = jnp.sum(acc, axis=1, keepdims=True) * (1.0 / n)
    xc = acc - mean                                          # centered (better numerics)
    var = jnp.sum(xc * xc, axis=1, keepdims=True) * (1.0 / n)
    scale = jax.lax.rsqrt(var + eps) * g_ref[...]
    y = xc * scale + bt_ref[...]
    o_ref[...] = jnp.where(y >= 0.0, y, slope * y)


def _deconv_kernel(x4_ref, w9_ref, b_ref, g_ref, bt_ref, o_ref, *, eps, slope, last):
    """ConvTranspose2d (k=3, s=2, p=1, out_pad=1) as 4 output-phase GEMMs.

    x4_ref : (4, Cin, M) shifted input slabs, order (dy,dx)=(0,0),(0,1),(1,0),(1,1)
    w9_ref : (9, Cout, Cin) per-tap weights, k = kh*3 + kw, each = W[:, :, kh, kw]^T
    o_ref  : (4, Cout, M) output phases (r,c parity) = ee, eo, oe, oo
    """
    x00 = x4_ref[0]
    x01 = x4_ref[1]
    x10 = x4_ref[2]
    x11 = x4_ref[3]

    def mm(k, x):
        return jnp.dot(w9_ref[k], x, preferred_element_type=jnp.float32)

    b = b_ref[...]
    y_ee = mm(4, x00) + b                                                     # w[1,1]
    y_eo = mm(3, x01) + mm(5, x00) + b                                        # w[1,0], w[1,2]
    y_oe = mm(1, x10) + mm(7, x00) + b                                        # w[0,1], w[2,1]
    y_oo = mm(0, x11) + mm(2, x10) + mm(6, x01) + mm(8, x00) + b              # corners

    if last:
        o_ref[0] = jnp.tanh(y_ee)
        o_ref[1] = jnp.tanh(y_eo)
        o_ref[2] = jnp.tanh(y_oe)
        o_ref[3] = jnp.tanh(y_oo)
    else:
        n = 4.0 * y_ee.shape[1]                         # stats over ALL output positions
        mean = (jnp.sum(y_ee, axis=1, keepdims=True) + jnp.sum(y_eo, axis=1, keepdims=True)
                + jnp.sum(y_oe, axis=1, keepdims=True) + jnp.sum(y_oo, axis=1, keepdims=True)
                ) * (1.0 / n)
        c0 = y_ee - mean
        c1 = y_eo - mean
        c2 = y_oe - mean
        c3 = y_oo - mean
        var = (jnp.sum(c0 * c0, axis=1, keepdims=True) + jnp.sum(c1 * c1, axis=1, keepdims=True)
               + jnp.sum(c2 * c2, axis=1, keepdims=True) + jnp.sum(c3 * c3, axis=1, keepdims=True)
               ) * (1.0 / n)
        scale = jax.lax.rsqrt(var + eps) * g_ref[...]
        shift = bt_ref[...]
        for idx, ci in enumerate((c0, c1, c2, c3)):
            v = ci * scale + shift
            o_ref[idx] = jnp.where(v >= 0.0, v, slope * v)


def _encode_head_kernel(x_ref, wm_ref, wv_ref, bm_ref, bv_ref, eps_ref,
                        mu_ref, lv_ref, z_ref):
    """Encoder Linear -> (mu, log_var), fused with the reparameterization."""
    x = x_ref[...]
    mu = jnp.dot(x, wm_ref[...], preferred_element_type=jnp.float32) + bm_ref[...]
    lv = jnp.dot(x, wv_ref[...], preferred_element_type=jnp.float32) + bv_ref[...]
    mu_ref[...] = mu
    lv_ref[...] = lv
    z_ref[...] = mu + eps_ref[...] * jnp.exp(lv * 0.5)


def _dec_input_kernel(z_ref, w_ref, b_ref, o_ref):
    """Decoder input Linear + ReLU."""
    h = jnp.dot(z_ref[...], w_ref[...], preferred_element_type=jnp.float32) + b_ref[...]
    o_ref[...] = jnp.maximum(h, 0.0)


# --------------------------- fused layer wrappers ----------------------------

def conv_bn_lrelu(act_cm, wpack, bias, gamma, beta, *, eps=1e-5, slope=0.01):
    """Conv2d(k=3,s=2,p=1)+BN+LeakyReLU. act_cm: channel-major (C, B, H, W)."""
    C, B, H, W = act_cm.shape
    Ho, Wo = (H - 1) // 2 + 1, (W - 1) // 2 + 1
    Cout = wpack.shape[0]
    M = B * Ho * Wo
    xp = jnp.pad(act_cm, ((0, 0), (0, 0), (1, 1), (1, 1)))
    taps = [xp[:, :, kh:kh + 2 * Ho - 1:2, kw:kw + 2 * Wo - 1:2].reshape(C, M)
            for kh in range(3) for kw in range(3)]
    patches = jnp.concatenate(taps, axis=0).astype(jnp.bfloat16)          # (9C, M)
    out = _call(functools.partial(_conv_bn_lrelu_kernel, eps=eps, slope=slope),
                jax.ShapeDtypeStruct((Cout, M), jnp.float32),
                patches, wpack, bias, gamma, beta)
    return out.reshape(Cout, B, Ho, Wo)


def deconv_layer(act_cm, w9, bias, gamma, beta, out_pad, last, *, eps=1e-5, slope=0.01):
    """ConvTranspose2d(k=3,s=2,p=1,out_pad)+BN+LeakyReLU (or Tanh for the last layer)."""
    Cin, B, H, W = act_cm.shape
    Cout = w9.shape[1]
    M = B * H * W
    xp = jnp.pad(act_cm, ((0, 0), (0, 0), (0, 1), (0, 1)))
    shifts = [xp[:, :, dy:dy + H, dx:dx + W].reshape(Cin, M)
              for dy in range(2) for dx in range(2)]
    x4 = jnp.stack(shifts, axis=0).astype(jnp.bfloat16)                   # (4, Cin, M)
    phases = _call(functools.partial(_deconv_kernel, eps=eps, slope=slope, last=last),
                   jax.ShapeDtypeStruct((4, Cout, M), jnp.float32),
                   x4, w9, bias, gamma, beta)
    # interleave the 4 parity phases into the full (Cout, B, 2H, 2W) output
    ph = phases.reshape(2, 2, Cout, B, H, W)                              # [r, s, ...]
    full = jnp.transpose(ph, (2, 3, 4, 0, 5, 1)).reshape(Cout, B, 2 * H, 2 * W)
    Hout = 2 * H - 1 + out_pad[0]
    Wout = 2 * W - 1 + out_pad[1]
    # TODO(synk): if output_padding == 0 (odd encoder sizes) the trimmed last row/col
    # should also be excluded from the in-kernel BN statistics; not needed here.
    return full[:, :, :Hout, :Wout]


def encode_head(flat, w_mu, w_lv, b_mu, b_lv, eps):
    B = flat.shape[0]
    L = w_mu.shape[1]
    shp = jax.ShapeDtypeStruct((B, L), jnp.float32)
    return _call(_encode_head_kernel, (shp, shp, shp),
                 flat.astype(jnp.bfloat16), w_mu, w_lv, b_mu, b_lv, eps)


def dec_input(z, w, b):
    B = z.shape[0]
    F = w.shape[1]
    return _call(_dec_input_kernel, jax.ShapeDtypeStruct((B, F), jnp.float32),
                 z.astype(jnp.bfloat16), w, b)


# ------------------------------ model (VAE) ----------------------------------

def init_params(key, input_shape, hidden_layers, latent_dim):
    channels_in, h, w = input_shape
    layer_dims = [channels_in] + list(hidden_layers)
    keys = iter(jax.random.split(key, 64))

    enc_h, enc_w = [h], [w]
    enc_convs = []
    for li in range(1, len(layer_dims)):
        cin, cout = layer_dims[li - 1], layer_dims[li]
        wgt = 0.1 * jax.random.normal(next(keys), (cout, cin, 3, 3), jnp.float32)
        # pack once at init: (Cout, 9*Cin), column order (kh, kw, cin)
        wpack = jnp.transpose(wgt, (0, 2, 3, 1)).reshape(cout, 9 * cin).astype(jnp.bfloat16)
        enc_convs.append((wpack,
                          jnp.zeros((cout, 1), jnp.float32),   # conv bias
                          jnp.ones((cout, 1), jnp.float32),    # BN gamma
                          jnp.zeros((cout, 1), jnp.float32)))  # BN beta
        enc_h.append((enc_h[-1] + 2 - 2 - 1) // 2 + 1)
        enc_w.append((enc_w[-1] + 2 - 2 - 1) // 2 + 1)
    fh, fw = enc_h[-1], enc_w[-1]
    flat_dim = layer_dims[-1] * fh * fw

    # encoder linear (PyTorch y = x @ W.T + b), stored pre-split as (in, out)
    w_lin = 0.05 * jax.random.normal(next(keys), (flat_dim, 2 * latent_dim), jnp.float32)
    b_lin = jnp.zeros((2 * latent_dim,), jnp.float32)
    w_mu = w_lin[:, :latent_dim].astype(jnp.bfloat16)
    w_lv = w_lin[:, latent_dim:].astype(jnp.bfloat16)
    b_mu = b_lin[:latent_dim].reshape(1, -1)
    b_lv = b_lin[latent_dim:].reshape(1, -1)

    w_dec = (0.05 * jax.random.normal(next(keys), (latent_dim, flat_dim), jnp.float32)
             ).astype(jnp.bfloat16)
    b_dec = jnp.zeros((1, flat_dim), jnp.float32)

    enc_h_rev = list(reversed(enc_h))
    hid_rev = list(reversed(list(hidden_layers)))
    dec_convs, dec_cfg = [], []
    for li in range(len(hid_rev)):
        out_pad = (1, 1) if enc_h_rev[li + 1] % 2 == 0 else (0, 0)
        cin = hid_rev[li]
        is_last = li == len(hid_rev) - 1
        cout = channels_in if is_last else hid_rev[li + 1]
        wgt = 0.1 * jax.random.normal(next(keys), (cin, cout, 3, 3), jnp.float32)
        # per-tap (Cout, Cin) matrices: w9[kh*3+kw] = W[:, :, kh, kw]^T
        w9 = jnp.transpose(wgt, (2, 3, 1, 0)).reshape(9, cout, cin).astype(jnp.bfloat16)
        dec_convs.append((w9,
                          jnp.zeros((cout, 1), jnp.float32),
                          jnp.ones((cout, 1), jnp.float32),
                          jnp.zeros((cout, 1), jnp.float32)))
        dec_cfg.append((out_pad, is_last))

    params = {
        "enc_convs": enc_convs,
        "w_mu": w_mu, "w_lv": w_lv, "b_mu": b_mu, "b_lv": b_lv,
        "w_dec": w_dec, "b_dec": b_dec,
        "dec_convs": dec_convs,
    }
    cfg = {
        "latent_dim": latent_dim,
        "dec_view": (layer_dims[-1], fh, fw),
        "dec_cfg": tuple(dec_cfg),
    }
    return params, cfg


def build_forward(cfg):
    dec_view = cfg["dec_view"]
    dec_cfg = cfg["dec_cfg"]

    def fwd(params, x_nchw, eps):
        # ---------------- encoder ----------------
        act = jnp.transpose(x_nchw.astype(jnp.float32), (1, 0, 2, 3))    # (C, B, H, W)
        for layer in params["enc_convs"]:
            act = conv_bn_lrelu(act, *layer)
        C, B, fh, fw = act.shape
        flat = jnp.transpose(act, (1, 0, 2, 3)).reshape(B, C * fh * fw)  # NCHW flatten
        mu, log_var, z = encode_head(flat, params["w_mu"], params["w_lv"],
                                     params["b_mu"], params["b_lv"], eps)
        # ---------------- decoder ----------------
        h = dec_input(z, params["w_dec"], params["b_dec"])
        Cd, dh, dw = dec_view
        act = jnp.transpose(h.reshape(B, Cd, dh, dw), (1, 0, 2, 3))      # (C, B, fh, fw)
        for (w9, bias, gamma, beta), (out_pad, is_last) in zip(params["dec_convs"], dec_cfg):
            act = deconv_layer(act, w9, bias, gamma, beta, out_pad, is_last)
        x_rec = jnp.transpose(act, (1, 0, 2, 3))                         # -> NCHW
        return x_rec, mu, log_var

    return jax.jit(fwd)


# ----------------------------------- main -------------------------------------

if __name__ == "__main__":
    key = jax.random.PRNGKey(0)
    k_param, k_data, k_eps = jax.random.split(key, 3)

    input_shape = (4, 16, 16)       # (C, H, W)
    hidden_layers = [8, 16]
    latent_dim = 8
    batch = 2

    params, cfg = init_params(k_param, input_shape, hidden_layers, latent_dim)
    x = jax.random.normal(k_data, (batch,) + input_shape, jnp.float32)   # NCHW input
    eps = jax.random.normal(k_eps, (batch, latent_dim), jnp.float32)

    forward = build_forward(cfg)
    x_rec, mu, log_var = forward(params, x, eps)
    jax.block_until_ready((x_rec, mu, log_var))

    assert x_rec.shape == (batch,) + input_shape, x_rec.shape
    assert mu.shape == (batch, latent_dim) and log_var.shape == (batch, latent_dim)
    assert bool(jnp.all(jnp.isfinite(x_rec)))
    assert bool(jnp.all(jnp.abs(x_rec) <= 1.0))   # tanh output range
    print("KERNEL_OK")
</pallas_src>

<mosaic_0001>
module attributes {stable_mosaic.version = 11 : i64} {
  func.func @_conv_bn_lrelu_kernel(%arg0: i32, %arg1: memref<36x128xbf16, #tpu.memory_space<vmem>>, %arg2: memref<8x36xbf16, #tpu.memory_space<vmem>>, %arg3: memref<8x1xf32, #tpu.memory_space<vmem>>, %arg4: memref<8x1xf32, #tpu.memory_space<vmem>>, %arg5: memref<8x1xf32, #tpu.memory_space<vmem>>, %arg6: memref<8x128xf32, #tpu.memory_space<vmem>>) attributes {dimension_semantics = [#tpu.dimension_semantics<arbitrary>], iteration_bounds = array<i64: 1>, scalar_prefetch = 0 : i64, scratch_operands = 0 : i64, tpu.core_type = #tpu.core_type<tc>, window_params = [{pipeline_mode = #tpu.pipeline_mode<synchronous>, transform_indices = @transform_0, window_bounds = array<i64: 36, 128>}, {pipeline_mode = #tpu.pipeline_mode<synchronous>, transform_indices = @transform_1, window_bounds = array<i64: 8, 36>}, {pipeline_mode = #tpu.pipeline_mode<synchronous>, transform_indices = @transform_2, window_bounds = array<i64: 8, 1>}, {pipeline_mode = #tpu.pipeline_mode<synchronous>, transform_indices = @transform_3, window_bounds = array<i64: 8, 1>}, {pipeline_mode = #tpu.pipeline_mode<synchronous>, transform_indices = @transform_4, window_bounds = array<i64: 8, 1>}, {pipeline_mode = #tpu.pipeline_mode<synchronous>, transform_indices = @transform_5, window_bounds = array<i64: 8, 128>}]} {
    %c0 = arith.constant 0 : index
    %c0_0 = arith.constant 0 : index
    %0 = vector.load %arg2[%c0, %c0_0] : memref<8x36xbf16, #tpu.memory_space<vmem>>, vector<8x36xbf16>
    %c0_1 = arith.constant 0 : index
    %c0_2 = arith.constant 0 : index
    %1 = vector.load %arg1[%c0_1, %c0_2] : memref<36x128xbf16, #tpu.memory_space<vmem>>, vector<36x128xbf16>
    %cst = arith.constant dense<0.000000e+00> : vector<8x128xf32>
    %2 = tpu.matmul %0, %1, %cst {dimension_numbers = #tpu.dot_dimension_numbers<[1], [0], [0], [1], [0, 0, 1, 1], [], []>} : vector<8x36xbf16>, vector<36x128xbf16>, vector<8x128xf32> -> vector<8x128xf32>
    %c0_3 = arith.constant 0 : index
    %c0_4 = arith.constant 0 : index
    %3 = vector.load %arg3[%c0_3, %c0_4] : memref<8x1xf32, #tpu.memory_space<vmem>>, vector<8x1xf32>
    %4 = vector.broadcast %3 : vector<8x1xf32> to vector<8x128xf32>
    %5 = arith.addf %2, %4 : vector<8x128xf32>
    %cst_5 = arith.constant dense<0.000000e+00> : vector<8xf32>
    %6 = vector.multi_reduction <add>, %5, %cst_5 [1] : vector<8x128xf32> to vector<8xf32>
    %7 = vector.shape_cast %6 : vector<8xf32> to vector<8x1xf32>
    %cst_6 = arith.constant 7.812500e-03 : f32
    %8 = vector.broadcast %cst_6 : f32 to vector<8x1xf32>
    %9 = arith.mulf %7, %8 : vector<8x1xf32>
    %10 = vector.broadcast %9 : vector<8x1xf32> to vector<8x128xf32>
    %11 = arith.subf %5, %10 : vector<8x128xf32>
    %12 = arith.mulf %11, %11 : vector<8x128xf32>
    %cst_7 = arith.constant dense<0.000000e+00> : vector<8xf32>
    %13 = vector.multi_reduction <add>, %12, %cst_7 [1] : vector<8x128xf32> to vector<8xf32>
    %14 = vector.shape_cast %13 : vector<8xf32> to vector<8x1xf32>
    %cst_8 = arith.constant 7.812500e-03 : f32
    %15 = vector.broadcast %cst_8 : f32 to vector<8x1xf32>
    %16 = arith.mulf %14, %15 : vector<8x1xf32>
    %cst_9 = arith.constant 9.99999974E-6 : f32
    %17 = vector.broadcast %cst_9 : f32 to vector<8x1xf32>
    %18 = arith.addf %16, %17 : vector<8x1xf32>
    %19 = math.rsqrt %18 : vector<8x1xf32>
    %c0_10 = arith.constant 0 : index
    %c0_11 = arith.constant 0 : index
    %20 = vector.load %arg4[%c0_10, %c0_11] : memref<8x1xf32, #tpu.memory_space<vmem>>, vector<8x1xf32>
    %21 = arith.mulf %19, %20 : vector<8x1xf32>
    %22 = vector.broadcast %21 : vector<8x1xf32> to vector<8x128xf32>
    %23 = arith.mulf %11, %22 : vector<8x128xf32>
    %c0_12 = arith.constant 0 : index
    %c0_13 = arith.constant 0 : index
    %24 = vector.load %arg5[%c0_12, %c0_13] : memref<8x1xf32, #tpu.memory_space<vmem>>, vector<8x1xf32>
    %25 = vector.broadcast %24 : vector<8x1xf32> to vector<8x128xf32>
    %26 = arith.addf %23, %25 : vector<8x128xf32>
    %cst_14 = arith.constant 0.000000e+00 : f32
    %27 = vector.broadcast %cst_14 : f32 to vector<8x128xf32>
    %28 = arith.cmpf oge, %26, %27 : vector<8x128xf32>
    %cst_15 = arith.constant 0.00999999977 : f32
    %29 = vector.broadcast %cst_15 : f32 to vector<8x128xf32>
    %30 = arith.mulf %29, %26 : vector<8x128xf32>
    %31 = arith.select %28, %26, %30 : vector<8x128xi1>, vector<8x128xf32>
    %c0_16 = arith.constant 0 : index
    %c0_17 = arith.constant 0 : index
    %32 = vector.load %arg6[%c0_16, %c0_17] : memref<8x128xf32, #tpu.memory_space<vmem>>, vector<8x128xf32>
    tpu.vector_store %arg6[%c0_16, %c0_17], %31 {strides = array<i32>} : memref<8x128xf32, #tpu.memory_space<vmem>>, vector<8x128xf32>,
    return
  }
  func.func @transform_0(%arg0: i32) -> (i32, i32) {
    %c0_i32 = arith.constant 0 : i32
    %c0_i32_0 = arith.constant 0 : i32
    %c0_i32_1 = arith.constant 0 : i32
    return %c0_i32, %c0_i32_0 : i32, i32
  }
  func.func @transform_1(%arg0: i32) -> (i32, i32) {
    %c0_i32 = arith.constant 0 : i32
    %c0_i32_0 = arith.constant 0 : i32
    %c0_i32_1 = arith.constant 0 : i32
    return %c0_i32, %c0_i32_0 : i32, i32
  }
  func.func @transform_2(%arg0: i32) -> (i32, i32) {
    %c0_i32 = arith.constant 0 : i32
    %c0_i32_0 = arith.constant 0 : i32
    %c0_i32_1 = arith.constant 0 : i32
    return %c0_i32, %c0_i32_0 : i32, i32
  }
  func.func @transform_3(%arg0: i32) -> (i32, i32) {
    %c0_i32 = arith.constant 0 : i32
    %c0_i32_0 = arith.constant 0 : i32
    %c0_i32_1 = arith.constant 0 : i32
    return %c0_i32, %c0_i32_0 : i32, i32
  }
  func.func @transform_4(%arg0: i32) -> (i32, i32) {
    %c0_i32 = arith.constant 0 : i32
    %c0_i32_0 = arith.constant 0 : i32
    %c0_i32_1 = arith.constant 0 : i32
    return %c0_i32, %c0_i32_0 : i32, i32
  }
  func.func @transform_5(%arg0: i32) -> (i32, i32) {
    %c0_i32 = arith.constant 0 : i32
    %c0_i32_0 = arith.constant 0 : i32
    %c0_i32_1 = arith.constant 0 : i32
    return %c0_i32, %c0_i32_0 : i32, i32
  }
}

module attributes {stable_mosaic.version = 11 : i64} {
  func.func @_conv_bn_lrelu_kernel(%arg0: i32, %arg1: memref<72x32xbf16, #tpu.memory_space<vmem>>, %arg2: memref<16x72xbf16, #tpu.memory_space<vmem>>, %arg3: memref<16x1xf32, #tpu.memory_space<vmem>>, %arg4: memref<16x1xf32, #tpu.memory_space<vmem>>, %arg5: memref<16x1xf32, #tpu.memory_space<vmem>>, %arg6: memref<16x32xf32, #tpu.memory_space<vmem>>) attributes {dimension_semantics = [#tpu.dimension_semantics<arbitrary>], iteration_bounds = array<i64: 1>, scalar_prefetch = 0 : i64, scratch_operands = 0 : i64, tpu.core_type = #tpu.core_type<tc>, window_params = [{pipeline_mode = #tpu.pipeline_mode<synchronous>, transform_indices = @transform_0, window_bounds = array<i64: 72, 32>}, {pipeline_mode = #tpu.pipeline_mode<synchronous>, transform_indices = @transform_1, window_bounds = array<i64: 16, 72>}, {pipeline_mode = #tpu.pipeline_mode<synchronous>, transform_indices = @transform_2, window_bounds = array<i64: 16, 1>}, {pipeline_mode = #tpu.pipeline_mode<synchronous>, transform_indices = @transform_3, window_bounds = array<i64: 16, 1>}, {pipeline_mode = #tpu.pipeline_mode<synchronous>, transform_indices = @transform_4, window_bounds = array<i64: 16, 1>}, {pipeline_mode = #tpu.pipeline_mode<synchronous>, transform_indices = @transform_5, window_bounds = array<i64: 16, 32>}]} {
    %c0 = arith.constant 0 : index
    %c0_0 = arith.constant 0 : index
    %0 = vector.load %arg2[%c0, %c0_0] : memref<16x72xbf16, #tpu.memory_space<vmem>>, vector<16x72xbf16>
    %c0_1 = arith.constant 0 : index
    %c0_2 = arith.constant 0 : index
    %1 = vector.load %arg1[%c0_1, %c0_2] : memref<72x32xbf16, #tpu.memory_space<vmem>>, vector<72x32xbf16>
    %cst = arith.constant dense<0.000000e+00> : vector<16x32xf32>
    %2 = tpu.matmul %0, %1, %cst {dimension_numbers = #tpu.dot_dimension_numbers<[1], [0], [0], [1], [0, 0, 1, 1], [], []>} : vector<16x72xbf16>, vector<72x32xbf16>, vector<16x32xf32> -> vector<16x32xf32>
    %c0_3 = arith.constant 0 : index
    %c0_4 = arith.constant 0 : index
    %3 = vector.load %arg3[%c0_3, %c0_4] : memref<16x1xf32, #tpu.memory_space<vmem>>, vector<16x1xf32>
    %4 = vector.broadcast %3 : vector<16x1xf32> to vector<16x32xf32>
    %5 = arith.addf %2, %4 : vector<16x32xf32>
    %cst_5 = arith.constant dense<0.000000e+00> : vector<16xf32>
    %6 = vector.multi_reduction <add>, %5, %cst_5 [1] : vector<16x32xf32> to vector<16xf32>
    %7 = vector.shape_cast %6 : vector<16xf32> to vector<16x1xf32>
    %cst_6 = arith.constant 3.125000e-02 : f32
    %8 = vector.broadcast %cst_6 : f32 to vector<16x1xf32>
    %9 = arith.mulf %7, %8 : vector<16x1xf32>
    %10 = vector.broadcast %9 : vector<16x1xf32> to vector<16x32xf32>
    %11 = arith.subf %5, %10 : vector<16x32xf32>
    %12 = arith.mulf %11, %11 : vector<16x32xf32>
    %cst_7 = arith.constant dense<0.000000e+00> : vector<16xf32>
    %13 = vector.multi_reduction <add>, %12, %cst_7 [1] : vector<16x32xf32> to vector<16xf32>
    %14 = vector.shape_cast %13 : vector<16xf32> to vector<16x1xf32>
    %cst_8 = arith.constant 3.125000e-02 : f32
    %15 = vector.broadcast %cst_8 : f32 to vector<16x1xf32>
    %16 = arith.mulf %14, %15 : vector<16x1xf32>
    %cst_9 = arith.constant 9.99999974E-6 : f32
    %17 = vector.broadcast %cst_9 : f32 to vector<16x1xf32>
    %18 = arith.addf %16, %17 : vector<16x1xf32>
    %19 = math.rsqrt %18 : vector<16x1xf32>
    %c0_10 = arith.constant 0 : index
    %c0_11 = arith.constant 0 : index
    %20 = vector.load %arg4[%c0_10, %c0_11] : memref<16x1xf32, #tpu.memory_space<vmem>>, vector<16x1xf32>
    %21 = arith.mulf %19, %20 : vector<16x1xf32>
    %22 = vector.broadcast %21 : vector<16x1xf32> to vector<16x32xf32>
    %23 = arith.mulf %11, %22 : vector<16x32xf32>
    %c0_12 = arith.constant 0 : index
    %c0_13 = arith.constant 0 : index
    %24 = vector.load %arg5[%c0_12, %c0_13] : memref<16x1xf32, #tpu.memory_space<vmem>>, vector<16x1xf32>
    %25 = vector.broadcast %24 : vector<16x1xf32> to vector<16x32xf32>
    %26 = arith.addf %23, %25 : vector<16x32xf32>
    %cst_14 = arith.constant 0.000000e+00 : f32
    %27 = vector.broadcast %cst_14 : f32 to vector<16x32xf32>
    %28 = arith.cmpf oge, %26, %27 : vector<16x32xf32>
    %cst_15 = arith.constant 0.00999999977 : f32
    %29 = vector.broadcast %cst_15 : f32 to vector<16x32xf32>
    %30 = arith.mulf %29, %26 : vector<16x32xf32>
    %31 = arith.select %28, %26, %30 : vector<16x32xi1>, vector<16x32xf32>
    %c0_16 = arith.constant 0 : index
    %c0_17 = arith.constant 0 : index
    %32 = vector.load %arg6[%c0_16, %c0_17] : memref<16x32xf32, #tpu.memory_space<vmem>>, vector<16x32xf32>
    tpu.vector_store %arg6[%c0_16, %c0_17], %31 {strides = array<i32>} : memref<16x32xf32, #tpu.memory_space<vmem>>, vector<16x32xf32>,
    return
  }
  func.func @transform_0(%arg0: i32) -> (i32, i32) {
    %c0_i32 = arith.constant 0 : i32
    %c0_i32_0 = arith.constant 0 : i32
    %c0_i32_1 = arith.constant 0 : i32
    return %c0_i32, %c0_i32_0 : i32, i32
  }
  func.func @transform_1(%arg0: i32) -> (i32, i32) {
    %c0_i32 = arith.constant 0 : i32
    %c0_i32_0 = arith.constant 0 : i32
    %c0_i32_1 = arith.constant 0 : i32
    return %c0_i32, %c0_i32_0 : i32, i32
  }
  func.func @transform_2(%arg0: i32) -> (i32, i32) {
    %c0_i32 = arith.constant 0 : i32
    %c0_i32_0 = arith.constant 0 : i32
    %c0_i32_1 = arith.constant 0 : i32
    return %c0_i32, %c0_i32_0 : i32, i32
  }
  func.func @transform_3(%arg0: i32) -> (i32, i32) {
    %c0_i32 = arith.constant 0 : i32
    %c0_i32_0 = arith.constant 0 : i32
    %c0_i32_1 = arith.constant 0 : i32
    return %c0_i32, %c0_i32_0 : i32, i32
  }
  func.func @transform_4(%arg0: i32) -> (i32, i32) {
    %c0_i32 = arith.constant 0 : i32
    %c0_i32_0 = arith.constant 0 : i32
    %c0_i32_1 = arith.constant 0 : i32
    return %c0_i32, %c0_i32_0 : i32, i32
  }
  func.func @transform_5(%arg0: i32) -> (i32, i32) {
    %c0_i32 = arith.constant 0 : i32
    %c0_i32_0 = arith.constant 0 : i32
    %c0_i32_1 = arith.constant 0 : i32
    return %c0_i32, %c0_i32_0 : i32, i32
  }
}

module attributes {stable_mosaic.version = 11 : i64} {
  func.func @_encode_head_kernel(%arg0: i32, %arg1: memref<2x256xbf16, #tpu.memory_space<vmem>>, %arg2: memref<256x8xbf16, #tpu.memory_space<vmem>>, %arg3: memref<256x8xbf16, #tpu.memory_space<vmem>>, %arg4: memref<1x8xf32, #tpu.memory_space<vmem>>, %arg5: memref<1x8xf32, #tpu.memory_space<vmem>>, %arg6: memref<2x8xf32, #tpu.memory_space<vmem>>, %arg7: memref<2x8xf32, #tpu.memory_space<vmem>>, %arg8: memref<2x8xf32, #tpu.memory_space<vmem>>, %arg9: memref<2x8xf32, #tpu.memory_space<vmem>>) attributes {dimension_semantics = [#tpu.dimension_semantics<arbitrary>], iteration_bounds = array<i64: 1>, scalar_prefetch = 0 : i64, scratch_operands = 0 : i64, tpu.core_type = #tpu.core_type<tc>, window_params = [{pipeline_mode = #tpu.pipeline_mode<synchronous>, transform_indices = @transform_0, window_bounds = array<i64: 2, 256>}, {pipeline_mode = #tpu.pipeline_mode<synchronous>, transform_indices = @transform_1, window_bounds = array<i64: 256, 8>}, {pipeline_mode = #tpu.pipeline_mode<synchronous>, transform_indices = @transform_2, window_bounds = array<i64: 256, 8>}, {pipeline_mode = #tpu.pipeline_mode<synchronous>, transform_indices = @transform_3, window_bounds = array<i64: 1, 8>}, {pipeline_mode = #tpu.pipeline_mode<synchronous>, transform_indices = @transform_4, window_bounds = array<i64: 1, 8>}, {pipeline_mode = #tpu.pipeline_mode<synchronous>, transform_indices = @transform_5, window_bounds = array<i64: 2, 8>}, {pipeline_mode = #tpu.pipeline_mode<synchronous>, transform_indices = @transform_6, window_bounds = array<i64: 2, 8>}, {pipeline_mode = #tpu.pipeline_mode<synchronous>, transform_indices = @transform_7, window_bounds = array<i64: 2, 8>}, {pipeline_mode = #tpu.pipeline_mode<synchronous>, transform_indices = @transform_8, window_bounds = array<i64: 2, 8>}]} {
    %c0 = arith.constant 0 : index
    %c0_0 = arith.constant 0 : index
    %0 = vector.load %arg1[%c0, %c0_0] : memref<2x256xbf16, #tpu.memory_space<vmem>>, vector<2x256xbf16>
    %c0_1 = arith.constant 0 : index
    %c0_2 = arith.constant 0 : index
    %1 = vector.load %arg2[%c0_1, %c0_2] : memref<256x8xbf16, #tpu.memory_space<vmem>>, vector<256x8xbf16>
    %cst = arith.constant dense<0.000000e+00> : vector<2x8xf32>
    %2 = tpu.matmul %0, %1, %cst {dimension_numbers = #tpu.dot_dimension_numbers<[1], [0], [0], [1], [0, 0, 1, 1], [], []>} : vector<2x256xbf16>, vector<256x8xbf16>, vector<2x8xf32> -> vector<2x8xf32>
    %c0_3 = arith.constant 0 : index
    %c0_4 = arith.constant 0 : index
    %3 = vector.load %arg4[%c0_3, %c0_4] : memref<1x8xf32, #tpu.memory_space<vmem>>, vector<1x8xf32>
    %4 = vector.broadcast %3 : vector<1x8xf32> to vector<2x8xf32>
    %5 = arith.addf %2, %4 : vector<2x8xf32>
    %c0_5 = arith.constant 0 : index
    %c0_6 = arith.constant 0 : index
    %6 = vector.load %arg3[%c0_5, %c0_6] : memref<256x8xbf16, #tpu.memory_space<vmem>>, vector<256x8xbf16>
    %cst_7 = arith.constant dense<0.000000e+00> : vector<2x8xf32>
    %7 = tpu.matmul %0, %6, %cst_7 {dimension_numbers = #tpu.dot_dimension_numbers<[1], [0], [0], [1], [0, 0, 1, 1], [], []>} : vector<2x256xbf16>, vector<256x8xbf16>, vector<2x8xf32> -> vector<2x8xf32>
    %c0_8 = arith.constant 0 : index
    %c0_9 = arith.constant 0 : index
    %8 = vector.load %arg5[%c0_8, %c0_9] : memref<1x8xf32, #tpu.memory_space<vmem>>, vector<1x8xf32>
    %9 = vector.broadcast %8 : vector<1x8xf32> to vector<2x8xf32>
    %10 = arith.addf %7, %9 : vector<2x8xf32>
    %c0_10 = arith.constant 0 : index
    %c0_11 = arith.constant 0 : index
    %11 = vector.load %arg7[%c0_10, %c0_11] : memref<2x8xf32, #tpu.memory_space<vmem>>, vector<2x8xf32>
    tpu.vector_store %arg7[%c0_10, %c0_11], %5 {strides = array<i32>} : memref<2x8xf32, #tpu.memory_space<vmem>>, vector<2x8xf32>,
    %c0_12 = arith.constant 0 : index
    %c0_13 = arith.constant 0 : index
    %12 = vector.load %arg8[%c0_12, %c0_13] : memref<2x8xf32, #tpu.memory_space<vmem>>, vector<2x8xf32>
    tpu.vector_store %arg8[%c0_12, %c0_13], %10 {strides = array<i32>} : memref<2x8xf32, #tpu.memory_space<vmem>>, vector<2x8xf32>,
    %c0_14 = arith.constant 0 : index
    %c0_15 = arith.constant 0 : index
    %13 = vector.load %arg6[%c0_14, %c0_15] : memref<2x8xf32, #tpu.memory_space<vmem>>, vector<2x8xf32>
    %cst_16 = arith.constant 5.000000e-01 : f32
    %14 = vector.broadcast %cst_16 : f32 to vector<2x8xf32>
    %15 = arith.mulf %10, %14 : vector<2x8xf32>
    %16 = math.exp %15 : vector<2x8xf32>
    %17 = arith.mulf %13, %16 : vector<2x8xf32>
    %18 = arith.addf %5, %17 : vector<2x8xf32>
    %c0_17 = arith.constant 0 : index
    %c0_18 = arith.constant 0 : index
    %19 = vector.load %arg9[%c0_17, %c0_18] : memref<2x8xf32, #tpu.memory_space<vmem>>, vector<2x8xf32>
    tpu.vector_store %arg9[%c0_17, %c0_18], %18 {strides = array<i32>} : memref<2x8xf32, #tpu.memory_space<vmem>>, vector<2x8xf32>,
    return
  }
  func.func @transform_0(%arg0: i32) -> (i32, i32) {
    %c0_i32 = arith.constant 0 : i32
    %c0_i32_0 = arith.constant 0 : i32
    %c0_i32_1 = arith.constant 0 : i32
    return %c0_i32, %c0_i32_0 : i32, i32
  }
  func.func @transform_1(%arg0: i32) -> (i32, i32) {
    %c0_i32 = arith.constant 0 : i32
    %c0_i32_0 = arith.constant 0 : i32
    %c0_i32_1 = arith.constant 0 : i32
    return %c0_i32, %c0_i32_0 : i32, i32
  }
  func.func @transform_2(%arg0: i32) -> (i32, i32) {
    %c0_i32 = arith.constant 0 : i32
    %c0_i32_0 = arith.constant 0 : i32
    %c0_i32_1 = arith.constant 0 : i32
    return %c0_i32, %c0_i32_0 : i32, i32
  }
  func.func @transform_3(%arg0: i32) -> (i32, i32) {
    %c0_i32 = arith.constant 0 : i32
    %c0_i32_0 = arith.constant 0 : i32
    %c0_i32_1 = arith.constant 0 : i32
    return %c0_i32, %c0_i32_0 : i32, i32
  }
  func.func @transform_4(%arg0: i32) -> (i32, i32) {
    %c0_i32 = arith.constant 0 : i32
    %c0_i32_0 = arith.constant 0 : i32
    %c0_i32_1 = arith.constant 0 : i32
    return %c0_i32, %c0_i32_0 : i32, i32
  }
  func.func @transform_5(%arg0: i32) -> (i32, i32) {
    %c0_i32 = arith.constant 0 : i32
    %c0_i32_0 = arith.constant 0 : i32
    %c0_i32_1 = arith.constant 0 : i32
    return %c0_i32, %c0_i32_0 : i32, i32
  }
  func.func @transform_6(%arg0: i32) -> (i32, i32) {
    %c0_i32 = arith.constant 0 : i32
    %c0_i32_0 = arith.constant 0 : i32
    %c0_i32_1 = arith.constant 0 : i32
    return %c0_i32, %c0_i32_0 : i32, i32
  }
  func.func @transform_7(%arg0: i32) -> (i32, i32) {
    %c0_i32 = arith.constant 0 : i32
    %c0_i32_0 = arith.constant 0 : i32
    %c0_i32_1 = arith.constant 0 : i32
    return %c0_i32, %c0_i32_0 : i32, i32
  }
  func.func @transform_8(%arg0: i32) -> (i32, i32) {
    %c0_i32 = arith.constant 0 : i32
    %c0_i32_0 = arith.constant 0 : i32
    %c0_i32_1 = arith.constant 0 : i32
    return %c0_i32, %c0_i32_0 : i32, i32
  }
}

module attributes {stable_mosaic.version = 11 : i64} {
  func.func @_dec_input_kernel(%arg0: i32, %arg1: memref<2x8xbf16, #tpu.memory_space<vmem>>, %arg2: memref<8x256xbf16, #tpu.memory_space<vmem>>, %arg3: memref<1x256xf32, #tpu.memory_space<vmem>>, %arg4: memref<2x256xf32, #tpu.memory_space<vmem>>) attributes {dimension_semantics = [#tpu.dimension_semantics<arbitrary>], iteration_bounds = array<i64: 1>, scalar_prefetch = 0 : i64, scratch_operands = 0 : i64, tpu.core_type = #tpu.core_type<tc>, window_params = [{pipeline_mode = #tpu.pipeline_mode<synchronous>, transform_indices = @transform_0, window_bounds = array<i64: 2, 8>}, {pipeline_mode = #tpu.pipeline_mode<synchronous>, transform_indices = @transform_1, window_bounds = array<i64: 8, 256>}, {pipeline_mode = #tpu.pipeline_mode<synchronous>, transform_indices = @transform_2, window_bounds = array<i64: 1, 256>}, {pipeline_mode = #tpu.pipeline_mode<synchronous>, transform_indices = @transform_3, window_bounds = array<i64: 2, 256>}]} {
    %c0 = arith.constant 0 : index
    %c0_0 = arith.constant 0 : index
    %0 = vector.load %arg1[%c0, %c0_0] : memref<2x8xbf16, #tpu.memory_space<vmem>>, vector<2x8xbf16>
    %c0_1 = arith.constant 0 : index
    %c0_2 = arith.constant 0 : index
    %1 = vector.load %arg2[%c0_1, %c0_2] : memref<8x256xbf16, #tpu.memory_space<vmem>>, vector<8x256xbf16>
    %cst = arith.constant dense<0.000000e+00> : vector<2x256xf32>
    %2 = tpu.matmul %0, %1, %cst {dimension_numbers = #tpu.dot_dimension_numbers<[1], [0], [0], [1], [0, 0, 1, 1], [], []>} : vector<2x8xbf16>, vector<8x256xbf16>, vector<2x256xf32> -> vector<2x256xf32>
    %c0_3 = arith.constant 0 : index
    %c0_4 = arith.constant 0 : index
    %3 = vector.load %arg3[%c0_3, %c0_4] : memref<1x256xf32, #tpu.memory_space<vmem>>, vector<1x256xf32>
    %4 = vector.broadcast %3 : vector<1x256xf32> to vector<2x256xf32>
    %5 = arith.addf %2, %4 : vector<2x256xf32>
    %cst_5 = arith.constant 0.000000e+00 : f32
    %6 = vector.broadcast %cst_5 : f32 to vector<2x256xf32>
    %7 = arith.maximumf %5, %6 : vector<2x256xf32>
    %c0_6 = arith.constant 0 : index
    %c0_7 = arith.constant 0 : index
    %8 = vector.load %arg4[%c0_6, %c0_7] : memref<2x256xf32, #tpu.memory_space<vmem>>, vector<2x256xf32>
    tpu.vector_store %arg4[%c0_6, %c0_7], %7 {strides = array<i32>} : memref<2x256xf32, #tpu.memory_space<vmem>>, vector<2x256xf32>,
    return
  }
  func.func @transform_0(%arg0: i32) -> (i32, i32) {
    %c0_i32 = arith.constant 0 : i32
    %c0_i32_0 = arith.constant 0 : i32
    %c0_i32_1 = arith.constant 0 : i32
    return %c0_i32, %c0_i32_0 : i32, i32
  }
  func.func @transform_1(%arg0: i32) -> (i32, i32) {
    %c0_i32 = arith.constant 0 : i32
    %c0_i32_0 = arith.constant 0 : i32
    %c0_i32_1 = arith.constant 0 : i32
    return %c0_i32, %c0_i32_0 : i32, i32
  }
  func.func @transform_2(%arg0: i32) -> (i32, i32) {
    %c0_i32 = arith.constant 0 : i32
    %c0_i32_0 = arith.constant 0 : i32
    %c0_i32_1 = arith.constant 0 : i32
    return %c0_i32, %c0_i32_0 : i32, i32
  }
  func.func @transform_3(%arg0: i32) -> (i32, i32) {
    %c0_i32 = arith.constant 0 : i32
    %c0_i32_0 = arith.constant 0 : i32
    %c0_i32_1 = arith.constant 0 : i32
    return %c0_i32, %c0_i32_0 : i32, i32
  }
}

module attributes {stable_mosaic.version = 11 : i64} {
  func.func @_deconv_kernel(%arg0: i32, %arg1: memref<4x16x32xbf16, #tpu.memory_space<vmem>>, %arg2: memref<9x8x16xbf16, #tpu.memory_space<vmem>>, %arg3: memref<8x1xf32, #tpu.memory_space<vmem>>, %arg4: memref<8x1xf32, #tpu.memory_space<vmem>>, %arg5: memref<8x1xf32, #tpu.memory_space<vmem>>, %arg6: memref<4x8x32xf32, #tpu.memory_space<vmem>>) attributes {dimension_semantics = [#tpu.dimension_semantics<arbitrary>], iteration_bounds = array<i64: 1>, scalar_prefetch = 0 : i64, scratch_operands = 0 : i64, tpu.core_type = #tpu.core_type<tc>, window_params = [{pipeline_mode = #tpu.pipeline_mode<synchronous>, transform_indices = @transform_0, window_bounds = array<i64: 4, 16, 32>}, {pipeline_mode = #tpu.pipeline_mode<synchronous>, transform_indices = @transform_1, window_bounds = array<i64: 9, 8, 16>}, {pipeline_mode = #tpu.pipeline_mode<synchronous>, transform_indices = @transform_2, window_bounds = array<i64: 8, 1>}, {pipeline_mode = #tpu.pipeline_mode<synchronous>, transform_indices = @transform_3, window_bounds = array<i64: 8, 1>}, {pipeline_mode = #tpu.pipeline_mode<synchronous>, transform_indices = @transform_4, window_bounds = array<i64: 8, 1>}, {pipeline_mode = #tpu.pipeline_mode<synchronous>, transform_indices = @transform_5, window_bounds = array<i64: 4, 8, 32>}]} {
    %c0 = arith.constant 0 : index
    %c0_0 = arith.constant 0 : index
    %c0_1 = arith.constant 0 : index
    %0 = vector.load %arg1[%c0, %c0_0, %c0_1] : memref<4x16x32xbf16, #tpu.memory_space<vmem>>, vector<1x16x32xbf16>
    %1 = vector.shape_cast %0 : vector<1x16x32xbf16> to vector<16x32xbf16>
    %c1 = arith.constant 1 : index
    %c0_2 = arith.constant 0 : index
    %c0_3 = arith.constant 0 : index
    %2 = vector.load %arg1[%c1, %c0_2, %c0_3] : memref<4x16x32xbf16, #tpu.memory_space<vmem>>, vector<1x16x32xbf16>
    %3 = vector.shape_cast %2 : vector<1x16x32xbf16> to vector<16x32xbf16>
    %c2 = arith.constant 2 : index
    %c0_4 = arith.constant 0 : index
    %c0_5 = arith.constant 0 : index
    %4 = vector.load %arg1[%c2, %c0_4, %c0_5] : memref<4x16x32xbf16, #tpu.memory_space<vmem>>, vector<1x16x32xbf16>
    %5 = vector.shape_cast %4 : vector<1x16x32xbf16> to vector<16x32xbf16>
    %c3 = arith.constant 3 : index
    %c0_6 = arith.constant 0 : index
    %c0_7 = arith.constant 0 : index
    %6 = vector.load %arg1[%c3, %c0_6, %c0_7] : memref<4x16x32xbf16, #tpu.memory_space<vmem>>, vector<1x16x32xbf16>
    %7 = vector.shape_cast %6 : vector<1x16x32xbf16> to vector<16x32xbf16>
    %c0_8 = arith.constant 0 : index
    %c0_9 = arith.constant 0 : index
    %8 = vector.load %arg3[%c0_8, %c0_9] : memref<8x1xf32, #tpu.memory_space<vmem>>, vector<8x1xf32>
    %c4 = arith.constant 4 : index
    %c0_10 = arith.constant 0 : index
    %c0_11 = arith.constant 0 : index
    %9 = vector.load %arg2[%c4, %c0_10, %c0_11] : memref<9x8x16xbf16, #tpu.memory_space<vmem>>, vector<1x8x16xbf16>
    %10 = vector.shape_cast %9 : vector<1x8x16xbf16> to vector<8x16xbf16>
    %cst = arith.constant dense<0.000000e+00> : vector<8x32xf32>
    %11 = tpu.matmul %10, %1, %cst {dimension_numbers = #tpu.dot_dimension_numbers<[1], [0], [0], [1], [0, 0, 1, 1], [], []>} : vector<8x16xbf16>, vector<16x32xbf16>, vector<8x32xf32> -> vector<8x32xf32>
    %12 = vector.broadcast %8 : vector<8x1xf32> to vector<8x32xf32>
    %13 = arith.addf %11, %12 : vector<8x32xf32>
    %c3_12 = arith.constant 3 : index
    %c0_13 = arith.constant 0 : index
    %c0_14 = arith.constant 0 : index
    %14 = vector.load %arg2[%c3_12, %c0_13, %c0_14] : memref<9x8x16xbf16, #tpu.memory_space<vmem>>, vector<1x8x16xbf16>
    %15 = vector.shape_cast %14 : vector<1x8x16xbf16> to vector<8x16xbf16>
    %cst_15 = arith.constant dense<0.000000e+00> : vector<8x32xf32>
    %16 = tpu.matmul %15, %3, %cst_15 {dimension_numbers = #tpu.dot_dimension_numbers<[1], [0], [0], [1], [0, 0, 1, 1], [], []>} : vector<8x16xbf16>, vector<16x32xbf16>, vector<8x32xf32> -> vector<8x32xf32>
    %c5 = arith.constant 5 : index
    %c0_16 = arith.constant 0 : index
    %c0_17 = arith.constant 0 : index
    %17 = vector.load %arg2[%c5, %c0_16, %c0_17] : memref<9x8x16xbf16, #tpu.memory_space<vmem>>, vector<1x8x16xbf16>
    %18 = vector.shape_cast %17 : vector<1x8x16xbf16> to vector<8x16xbf16>
    %cst_18 = arith.constant dense<0.000000e+00> : vector<8x32xf32>
    %19 = tpu.matmul %18, %1, %cst_18 {dimension_numbers = #tpu.dot_dimension_numbers<[1], [0], [0], [1], [0, 0, 1, 1], [], []>} : vector<8x16xbf16>, vector<16x32xbf16>, vector<8x32xf32> -> vector<8x32xf32>
    %20 = arith.addf %16, %19 : vector<8x32xf32>
    %21 = vector.broadcast %8 : vector<8x1xf32> to vector<8x32xf32>
    %22 = arith.addf %20, %21 : vector<8x32xf32>
    %c1_19 = arith.constant 1 : index
    %c0_20 = arith.constant 0 : index
    %c0_21 = arith.constant 0 : index
    %23 = vector.load %arg2[%c1_19, %c0_20, %c0_21] : memref<9x8x16xbf16, #tpu.memory_space<vmem>>, vector<1x8x16xbf16>
    %24 = vector.shape_cast %23 : vector<1x8x16xbf16> to vector<8x16xbf16>
    %cst_22 = arith.constant dense<0.000000e+00> : vector<8x32xf32>
    %25 = tpu.matmul %24, %5, %cst_22 {dimension_numbers = #tpu.dot_dimension_numbers<[1], [0], [0], [1], [0, 0, 1, 1], [], []>} : vector<8x16xbf16>, vector<16x32xbf16>, vector<8x32xf32> -> vector<8x32xf32>
    %c7 = arith.constant 7 : index
    %c0_23 = arith.constant 0 : index
    %c0_24 = arith.constant 0 : index
    %26 = vector.load %arg2[%c7, %c0_23, %c0_24] : memref<9x8x16xbf16, #tpu.memory_space<vmem>>, vector<1x8x16xbf16>
    %27 = vector.shape_cast %26 : vector<1x8x16xbf16> to vector<8x16xbf16>
    %cst_25 = arith.constant dense<0.000000e+00> : vector<8x32xf32>
    %28 = tpu.matmul %27, %1, %cst_25 {dimension_numbers = #tpu.dot_dimension_numbers<[1], [0], [0], [1], [0, 0, 1, 1], [], []>} : vector<8x16xbf16>, vector<16x32xbf16>, vector<8x32xf32> -> vector<8x32xf32>
    %29 = arith.addf %25, %28 : vector<8x32xf32>
    %30 = vector.broadcast %8 : vector<8x1xf32> to vector<8x32xf32>
    %31 = arith.addf %29, %30 : vector<8x32xf32>
    %c0_26 = arith.constant 0 : index
    %c0_27 = arith.constant 0 : index
    %c0_28 = arith.constant 0 : index
    %32 = vector.load %arg2[%c0_26, %c0_27, %c0_28] : memref<9x8x16xbf16, #tpu.memory_space<vmem>>, vector<1x8x16xbf16>
    %33 = vector.shape_cast %32 : vector<1x8x16xbf16> to vector<8x16xbf16>
    %cst_29 = arith.constant dense<0.000000e+00> : vector<8x32xf32>
    %34 = tpu.matmul %33, %7, %cst_29 {dimension_numbers = #tpu.dot_dimension_numbers<[1], [0], [0], [1], [0, 0, 1, 1], [], []>} : vector<8x16xbf16>, vector<16x32xbf16>, vector<8x32xf32> -> vector<8x32xf32>
    %c2_30 = arith.constant 2 : index
    %c0_31 = arith.constant 0 : index
    %c0_32 = arith.constant 0 : index
    %35 = vector.load %arg2[%c2_30, %c0_31, %c0_32] : memref<9x8x16xbf16, #tpu.memory_space<vmem>>, vector<1x8x16xbf16>
    %36 = vector.shape_cast %35 : vector<1x8x16xbf16> to vector<8x16xbf16>
    %cst_33 = arith.constant dense<0.000000e+00> : vector<8x32xf32>
    %37 = tpu.matmul %36, %5, %cst_33 {dimension_numbers = #tpu.dot_dimension_numbers<[1], [0], [0], [1], [0, 0, 1, 1], [], []>} : vector<8x16xbf16>, vector<16x32xbf16>, vector<8x32xf32> -> vector<8x32xf32>
    %38 = arith.addf %34, %37 : vector<8x32xf32>
    %c6 = arith.constant 6 : index
    %c0_34 = arith.constant 0 : index
    %c0_35 = arith.constant 0 : index
    %39 = vector.load %arg2[%c6, %c0_34, %c0_35] : memref<9x8x16xbf16, #tpu.memory_space<vmem>>, vector<1x8x16xbf16>
    %40 = vector.shape_cast %39 : vector<1x8x16xbf16> to vector<8x16xbf16>
    %cst_36 = arith.constant dense<0.000000e+00> : vector<8x32xf32>
    %41 = tpu.matmul %40, %3, %cst_36 {dimension_numbers = #tpu.dot_dimension_numbers<[1], [0], [0], [1], [0, 0, 1, 1], [], []>} : vector<8x16xbf16>, vector<16x32xbf16>, vector<8x32xf32> -> vector<8x32xf32>
    %42 = arith.addf %38, %41 : vector<8x32xf32>
    %c8 = arith.constant 8 : index
    %c0_37 = arith.constant 0 : index
    %c0_38 = arith.constant 0 : index
    %43 = vector.load %arg2[%c8, %c0_37, %c0_38] : memref<9x8x16xbf16, #tpu.memory_space<vmem>>, vector<1x8x16xbf16>
    %44 = vector.shape_cast %43 : vector<1x8x16xbf16> to vector<8x16xbf16>
    %cst_39 = arith.constant dense<0.000000e+00> : vector<8x32xf32>
    %45 = tpu.matmul %44, %1, %cst_39 {dimension_numbers = #tpu.dot_dimension_numbers<[1], [0], [0], [1], [0, 0, 1, 1], [], []>} : vector<8x16xbf16>, vector<16x32xbf16>, vector<8x32xf32> -> vector<8x32xf32>
    %46 = arith.addf %42, %45 : vector<8x32xf32>
    %47 = vector.broadcast %8 : vector<8x1xf32> to vector<8x32xf32>
    %48 = arith.addf %46, %47 : vector<8x32xf32>
    %cst_40 = arith.constant dense<0.000000e+00> : vector<8xf32>
    %49 = vector.multi_reduction <add>, %13, %cst_40 [1] : vector<8x32xf32> to vector<8xf32>
    %50 = vector.shape_cast %49 : vector<8xf32> to vector<8x1xf32>
    %cst_41 = arith.constant dense<0.000000e+00> : vector<8xf32>
    %51 = vector.multi_reduction <add>, %22, %cst_41 [1] : vector<8x32xf32> to vector<8xf32>
    %52 = vector.shape_cast %51 : vector<8xf32> to vector<8x1xf32>
    %53 = arith.addf %50, %52 : vector<8x1xf32>
    %cst_42 = arith.constant dense<0.000000e+00> : vector<8xf32>
    %54 = vector.multi_reduction <add>, %31, %cst_42 [1] : vector<8x32xf32> to vector<8xf32>
    %55 = vector.shape_cast %54 : vector<8xf32> to vector<8x1xf32>
    %56 = arith.addf %53, %55 : vector<8x1xf32>
    %cst_43 = arith.constant dense<0.000000e+00> : vector<8xf32>
    %57 = vector.multi_reduction <add>, %48, %cst_43 [1] : vector<8x32xf32> to vector<8xf32>
    %58 = vector.shape_cast %57 : vector<8xf32> to vector<8x1xf32>
    %59 = arith.addf %56, %58 : vector<8x1xf32>
    %cst_44 = arith.constant 7.812500e-03 : f32
    %60 = vector.broadcast %cst_44 : f32 to vector<8x1xf32>
    %61 = arith.mulf %59, %60 : vector<8x1xf32>
    %62 = vector.broadcast %61 : vector<8x1xf32> to vector<8x32xf32>
    %63 = arith.subf %13, %62 : vector<8x32xf32>
    %64 = vector.broadcast %61 : vector<8x1xf32> to vector<8x32xf32>
    %65 = arith.subf %22, %64 : vector<8x32xf32>
    %66 = vector.broadcast %61 : vector<8x1xf32> to vector<8x32xf32>
    %67 = arith.subf %31, %66 : vector<8x32xf32>
    %68 = vector.broadcast %61 : vector<8x1xf32> to vector<8x32xf32>
    %69 = arith.subf %48, %68 : vector<8x32xf32>
    %70 = arith.mulf %63, %63 : vector<8x32xf32>
    %cst_45 = arith.constant dense<0.000000e+00> : vector<8xf32>
    %71 = vector.multi_reduction <add>, %70, %cst_45 [1] : vector<8x32xf32> to vector<8xf32>
    %72 = vector.shape_cast %71 : vector<8xf32> to vector<8x1xf32>
    %73 = arith.mulf %65, %65 : vector<8x32xf32>
    %cst_46 = arith.constant dense<0.000000e+00> : vector<8xf32>
    %74 = vector.multi_reduction <add>, %73, %cst_46 [1] : vector<8x32xf32> to vector<8xf32>
    %75 = vector.shape_cast %74 : vector<8xf32> to vector<8x1xf32>
    %76 = arith.addf %72, %75 : vector<8x1xf32>
    %77 = arith.mulf %67, %67 : vector<8x32xf32>
    %cst_47 = arith.constant dense<0.000000e+00> : vector<8xf32>
    %78 = vector.multi_reduction <add>, %77, %cst_47 [1] : vector<8x32xf32> to vector<8xf32>
    %79 = vector.shape_cast %78 : vector<8xf32> to vector<8x1xf32>
    %80 = arith.addf %76, %79 : vector<8x1xf32>
    %81 = arith.mulf %69, %69 : vector<8x32xf32>
    %cst_48 = arith.constant dense<0.000000e+00> : vector<8xf32>
    %82 = vector.multi_reduction <add>, %81, %cst_48 [1] : vector<8x32xf32> to vector<8xf32>
    %83 = vector.shape_cast %82 : vector<8xf32> to vector<8x1xf32>
    %84 = arith.addf %80, %83 : vector<8x1xf32>
    %cst_49 = arith.constant 7.812500e-03 : f32
    %85 = vector.broadcast %cst_49 : f32 to vector<8x1xf32>
    %86 = arith.mulf %84, %85 : vector<8x1xf32>
    %cst_50 = arith.constant 9.99999974E-6 : f32
    %87 = vector.broadcast %cst_50 : f32 to vector<8x1xf32>
    %88 = arith.addf %86, %87 : vector<8x1xf32>
    %89 = math.rsqrt %88 : vector<8x1xf32>
    %c0_51 = arith.constant 0 : index
    %c0_52 = arith.constant 0 : index
    %90 = vector.load %arg4[%c0_51, %c0_52] : memref<8x1xf32, #tpu.memory_space<vmem>>, vector<8x1xf32>
    %91 = arith.mulf %89, %90 : vector<8x1xf32>
    %c0_53 = arith.constant 0 : index
    %c0_54 = arith.constant 0 : index
    %92 = vector.load %arg5[%c0_53, %c0_54] : memref<8x1xf32, #tpu.memory_space<vmem>>, vector<8x1xf32>
    %93 = vector.broadcast %91 : vector<8x1xf32> to vector<8x32xf32>
    %94 = arith.mulf %63, %93 : vector<8x32xf32>
    %95 = vector.broadcast %92 : vector<8x1xf32> to vector<8x32xf32>
    %96 = arith.addf %94, %95 : vector<8x32xf32>
    %cst_55 = arith.constant 0.000000e+00 : f32
    %97 = vector.broadcast %cst_55 : f32 to vector<8x32xf32>
    %98 = arith.cmpf oge, %96, %97 : vector<8x32xf32>
    %cst_56 = arith.constant 0.00999999977 : f32
    %99 = vector.broadcast %cst_56 : f32 to vector<8x32xf32>
    %100 = arith.mulf %99, %96 : vector<8x32xf32>
    %101 = arith.select %98, %96, %100 : vector<8x32xi1>, vector<8x32xf32>
    %c0_57 = arith.constant 0 : index
    %c0_58 = arith.constant 0 : index
    %c0_59 = arith.constant 0 : index
    %102 = vector.load %arg6[%c0_57, %c0_58, %c0_59] : memref<4x8x32xf32, #tpu.memory_space<vmem>>, vector<1x8x32xf32>
    %103 = vector.shape_cast %102 : vector<1x8x32xf32> to vector<8x32xf32>
    %104 = vector.shape_cast %101 : vector<8x32xf32> to vector<1x8x32xf32>
    tpu.vector_store %arg6[%c0_57, %c0_58, %c0_59], %104 {strides = array<i32>} : memref<4x8x32xf32, #tpu.memory_space<vmem>>, vector<1x8x32xf32>,
    %105 = vector.broadcast %91 : vector<8x1xf32> to vector<8x32xf32>
    %106 = arith.mulf %65, %105 : vector<8x32xf32>
    %107 = vector.broadcast %92 : vector<8x1xf32> to vector<8x32xf32>
    %108 = arith.addf %106, %107 : vector<8x32xf32>
    %cst_60 = arith.constant 0.000000e+00 : f32
    %109 = vector.broadcast %cst_60 : f32 to vector<8x32xf32>
    %110 = arith.cmpf oge, %108, %109 : vector<8x32xf32>
    %cst_61 = arith.constant 0.00999999977 : f32
    %111 = vector.broadcast %cst_61 : f32 to vector<8x32xf32>
    %112 = arith.mulf %111, %108 : vector<8x32xf32>
    %113 = arith.select %110, %108, %112 : vector<8x32xi1>, vector<8x32xf32>
    %c1_62 = arith.constant 1 : index
    %c0_63 = arith.constant 0 : index
    %c0_64 = arith.constant 0 : index
    %114 = vector.load %arg6[%c1_62, %c0_63, %c0_64] : memref<4x8x32xf32, #tpu.memory_space<vmem>>, vector<1x8x32xf32>
    %115 = vector.shape_cast %114 : vector<1x8x32xf32> to vector<8x32xf32>
    %116 = vector.shape_cast %113 : vector<8x32xf32> to vector<1x8x32xf32>
    tpu.vector_store %arg6[%c1_62, %c0_63, %c0_64], %116 {strides = array<i32>} : memref<4x8x32xf32, #tpu.memory_space<vmem>>, vector<1x8x32xf32>,
    %117 = vector.broadcast %91 : vector<8x1xf32> to vector<8x32xf32>
    %118 = arith.mulf %67, %117 : vector<8x32xf32>
    %119 = vector.broadcast %92 : vector<8x1xf32> to vector<8x32xf32>
    %120 = arith.addf %118, %119 : vector<8x32xf32>
    %cst_65 = arith.constant 0.000000e+00 : f32
    %121 = vector.broadcast %cst_65 : f32 to vector<8x32xf32>
    %122 = arith.cmpf oge, %120, %121 : vector<8x32xf32>
    %cst_66 = arith.constant 0.00999999977 : f32
    %123 = vector.broadcast %cst_66 : f32 to vector<8x32xf32>
    %124 = arith.mulf %123, %120 : vector<8x32xf32>
    %125 = arith.select %122, %120, %124 : vector<8x32xi1>, vector<8x32xf32>
    %c2_67 = arith.constant 2 : index
    %c0_68 = arith.constant 0 : index
    %c0_69 = arith.constant 0 : index
    %126 = vector.load %arg6[%c2_67, %c0_68, %c0_69] : memref<4x8x32xf32, #tpu.memory_space<vmem>>, vector<1x8x32xf32>
    %127 = vector.shape_cast %126 : vector<1x8x32xf32> to vector<8x32xf32>
    %128 = vector.shape_cast %125 : vector<8x32xf32> to vector<1x8x32xf32>
    tpu.vector_store %arg6[%c2_67, %c0_68, %c0_69], %128 {strides = array<i32>} : memref<4x8x32xf32, #tpu.memory_space<vmem>>, vector<1x8x32xf32>,
    %129 = vector.broadcast %91 : vector<8x1xf32> to vector<8x32xf32>
    %130 = arith.mulf %69, %129 : vector<8x32xf32>
    %131 = vector.broadcast %92 : vector<8x1xf32> to vector<8x32xf32>
    %132 = arith.addf %130, %131 : vector<8x32xf32>
    %cst_70 = arith.constant 0.000000e+00 : f32
    %133 = vector.broadcast %cst_70 : f32 to vector<8x32xf32>
    %134 = arith.cmpf oge, %132, %133 : vector<8x32xf32>
    %cst_71 = arith.constant 0.00999999977 : f32
    %135 = vector.broadcast %cst_71 : f32 to vector<8x32xf32>
    %136 = arith.mulf %135, %132 : vector<8x32xf32>
    %137 = arith.select %134, %132, %136 : vector<8x32xi1>, vector<8x32xf32>
    %c3_72 = arith.constant 3 : index
    %c0_73 = arith.constant 0 : index
    %c0_74 = arith.constant 0 : index
    %138 = vector.load %arg6[%c3_72, %c0_73, %c0_74] : memref<4x8x32xf32, #tpu.memory_space<vmem>>, vector<1x8x32xf32>
    %139 = vector.shape_cast %138 : vector<1x8x32xf32> to vector<8x32xf32>
    %140 = vector.shape_cast %137 : vector<8x32xf32> to vector<1x8x32xf32>
    tpu.vector_store %arg6[%c3_72, %c0_73, %c0_74], %140 {strides = array<i32>} : memref<4x8x32xf32, #tpu.memory_space<vmem>>, vector<1x8x32xf32>,
    return
  }
  func.func @transform_0(%arg0: i32) -> (i32, i32, i32) {
    %c0_i32 = arith.constant 0 : i32
    %c0_i32_0 = arith.constant 0 : i32
    %c0_i32_1 = arith.constant 0 : i32
    %c0_i32_2 = arith.constant 0 : i32
    return %c0_i32, %c0_i32_0, %c0_i32_1 : i32, i32, i32
  }
  func.func @transform_1(%arg0: i32) -> (i32, i32, i32) {
    %c0_i32 = arith.constant 0 : i32
    %c0_i32_0 = arith.constant 0 : i32
    %c0_i32_1 = arith.constant 0 : i32
    %c0_i32_2 = arith.constant 0 : i32
    return %c0_i32, %c0_i32_0, %c0_i32_1 : i32, i32, i32
  }
  func.func @transform_2(%arg0: i32) -> (i32, i32) {
    %c0_i32 = arith.constant 0 : i32
    %c0_i32_0 = arith.constant 0 : i32
    %c0_i32_1 = arith.constant 0 : i32
    return %c0_i32, %c0_i32_0 : i32, i32
  }
  func.func @transform_3(%arg0: i32) -> (i32, i32) {
    %c0_i32 = arith.constant 0 : i32
    %c0_i32_0 = arith.constant 0 : i32
    %c0_i32_1 = arith.constant 0 : i32
    return %c0_i32, %c0_i32_0 : i32, i32
  }
  func.func @transform_4(%arg0: i32) -> (i32, i32) {
    %c0_i32 = arith.constant 0 : i32
    %c0_i32_0 = arith.constant 0 : i32
    %c0_i32_1 = arith.constant 0 : i32
    return %c0_i32, %c0_i32_0 : i32, i32
  }
  func.func @transform_5(%arg0: i32) -> (i32, i32, i32) {
    %c0_i32 = arith.constant 0 : i32
    %c0_i32_0 = arith.constant 0 : i32
    %c0_i32_1 = arith.constant 0 : i32
    %c0_i32_2 = arith.constant 0 : i32
    return %c0_i32, %c0_i32_0, %c0_i32_1 : i32, i32, i32
  }
}

module attributes {stable_mosaic.version = 11 : i64} {
  func.func @_deconv_kernel(%arg0: i32, %arg1: memref<4x8x128xbf16, #tpu.memory_space<vmem>>, %arg2: memref<9x4x8xbf16, #tpu.memory_space<vmem>>, %arg3: memref<4x1xf32, #tpu.memory_space<vmem>>, %arg4: memref<4x1xf32, #tpu.memory_space<vmem>>, %arg5: memref<4x1xf32, #tpu.memory_space<vmem>>, %arg6: memref<4x4x128xf32, #tpu.memory_space<vmem>>) attributes {dimension_semantics = [#tpu.dimension_semantics<arbitrary>], iteration_bounds = array<i64: 1>, scalar_prefetch = 0 : i64, scratch_operands = 0 : i64, tpu.core_type = #tpu.core_type<tc>, window_params = [{pipeline_mode = #tpu.pipeline_mode<synchronous>, transform_indices = @transform_0, window_bounds = array<i64: 4, 8, 128>}, {pipeline_mode = #tpu.pipeline_mode<synchronous>, transform_indices = @transform_1, window_bounds = array<i64: 9, 4, 8>}, {pipeline_mode = #tpu.pipeline_mode<synchronous>, transform_indices = @transform_2, window_bounds = array<i64: 4, 1>}, {pipeline_mode = #tpu.pipeline_mode<synchronous>, transform_indices = @transform_3, window_bounds = array<i64: 4, 1>}, {pipeline_mode = #tpu.pipeline_mode<synchronous>, transform_indices = @transform_4, window_bounds = array<i64: 4, 1>}, {pipeline_mode = #tpu.pipeline_mode<synchronous>, transform_indices = @transform_5, window_bounds = array<i64: 4, 4, 128>}]} {
    %c0 = arith.constant 0 : index
    %c0_0 = arith.constant 0 : index
    %c0_1 = arith.constant 0 : index
    %0 = vector.load %arg1[%c0, %c0_0, %c0_1] : memref<4x8x128xbf16, #tpu.memory_space<vmem>>, vector<1x8x128xbf16>
    %1 = vector.shape_cast %0 : vector<1x8x128xbf16> to vector<8x128xbf16>
    %c1 = arith.constant 1 : index
    %c0_2 = arith.constant 0 : index
    %c0_3 = arith.constant 0 : index
    %2 = vector.load %arg1[%c1, %c0_2, %c0_3] : memref<4x8x128xbf16, #tpu.memory_space<vmem>>, vector<1x8x128xbf16>
    %3 = vector.shape_cast %2 : vector<1x8x128xbf16> to vector<8x128xbf16>
    %c2 = arith.constant 2 : index
    %c0_4 = arith.constant 0 : index
    %c0_5 = arith.constant 0 : index
    %4 = vector.load %arg1[%c2, %c0_4, %c0_5] : memref<4x8x128xbf16, #tpu.memory_space<vmem>>, vector<1x8x128xbf16>
    %5 = vector.shape_cast %4 : vector<1x8x128xbf16> to vector<8x128xbf16>
    %c3 = arith.constant 3 : index
    %c0_6 = arith.constant 0 : index
    %c0_7 = arith.constant 0 : index
    %6 = vector.load %arg1[%c3, %c0_6, %c0_7] : memref<4x8x128xbf16, #tpu.memory_space<vmem>>, vector<1x8x128xbf16>
    %7 = vector.shape_cast %6 : vector<1x8x128xbf16> to vector<8x128xbf16>
    %c0_8 = arith.constant 0 : index
    %c0_9 = arith.constant 0 : index
    %8 = vector.load %arg3[%c0_8, %c0_9] : memref<4x1xf32, #tpu.memory_space<vmem>>, vector<4x1xf32>
    %c4 = arith.constant 4 : index
    %c0_10 = arith.constant 0 : index
    %c0_11 = arith.constant 0 : index
    %9 = vector.load %arg2[%c4, %c0_10, %c0_11] : memref<9x4x8xbf16, #tpu.memory_space<vmem>>, vector<1x4x8xbf16>
    %10 = vector.shape_cast %9 : vector<1x4x8xbf16> to vector<4x8xbf16>
    %cst = arith.constant dense<0.000000e+00> : vector<4x128xf32>
    %11 = tpu.matmul %10, %1, %cst {dimension_numbers = #tpu.dot_dimension_numbers<[1], [0], [0], [1], [0, 0, 1, 1], [], []>} : vector<4x8xbf16>, vector<8x128xbf16>, vector<4x128xf32> -> vector<4x128xf32>
    %12 = vector.broadcast %8 : vector<4x1xf32> to vector<4x128xf32>
    %13 = arith.addf %11, %12 : vector<4x128xf32>
    %c3_12 = arith.constant 3 : index
    %c0_13 = arith.constant 0 : index
    %c0_14 = arith.constant 0 : index
    %14 = vector.load %arg2[%c3_12, %c0_13, %c0_14] : memref<9x4x8xbf16, #tpu.memory_space<vmem>>, vector<1x4x8xbf16>
    %15 = vector.shape_cast %14 : vector<1x4x8xbf16> to vector<4x8xbf16>
    %cst_15 = arith.constant dense<0.000000e+00> : vector<4x128xf32>
    %16 = tpu.matmul %15, %3, %cst_15 {dimension_numbers = #tpu.dot_dimension_numbers<[1], [0], [0], [1], [0, 0, 1, 1], [], []>} : vector<4x8xbf16>, vector<8x128xbf16>, vector<4x128xf32> -> vector<4x128xf32>
    %c5 = arith.constant 5 : index
    %c0_16 = arith.constant 0 : index
    %c0_17 = arith.constant 0 : index
    %17 = vector.load %arg2[%c5, %c0_16, %c0_17] : memref<9x4x8xbf16, #tpu.memory_space<vmem>>, vector<1x4x8xbf16>
    %18 = vector.shape_cast %17 : vector<1x4x8xbf16> to vector<4x8xbf16>
    %cst_18 = arith.constant dense<0.000000e+00> : vector<4x128xf32>
    %19 = tpu.matmul %18, %1, %cst_18 {dimension_numbers = #tpu.dot_dimension_numbers<[1], [0], [0], [1], [0, 0, 1, 1], [], []>} : vector<4x8xbf16>, vector<8x128xbf16>, vector<4x128xf32> -> vector<4x128xf32>
    %20 = arith.addf %16, %19 : vector<4x128xf32>
    %21 = vector.broadcast %8 : vector<4x1xf32> to vector<4x128xf32>
    %22 = arith.addf %20, %21 : vector<4x128xf32>
    %c1_19 = arith.constant 1 : index
    %c0_20 = arith.constant 0 : index
    %c0_21 = arith.constant 0 : index
    %23 = vector.load %arg2[%c1_19, %c0_20, %c0_21] : memref<9x4x8xbf16, #tpu.memory_space<vmem>>, vector<1x4x8xbf16>
    %24 = vector.shape_cast %23 : vector<1x4x8xbf16> to vector<4x8xbf16>
    %cst_22 = arith.constant dense<0.000000e+00> : vector<4x128xf32>
    %25 = tpu.matmul %24, %5, %cst_22 {dimension_numbers = #tpu.dot_dimension_numbers<[1], [0], [0], [1], [0, 0, 1, 1], [], []>} : vector<4x8xbf16>, vector<8x128xbf16>, vector<4x128xf32> -> vector<4x128xf32>
    %c7 = arith.constant 7 : index
    %c0_23 = arith.constant 0 : index
    %c0_24 = arith.constant 0 : index
    %26 = vector.load %arg2[%c7, %c0_23, %c0_24] : memref<9x4x8xbf16, #tpu.memory_space<vmem>>, vector<1x4x8xbf16>
    %27 = vector.shape_cast %26 : vector<1x4x8xbf16> to vector<4x8xbf16>
    %cst_25 = arith.constant dense<0.000000e+00> : vector<4x128xf32>
    %28 = tpu.matmul %27, %1, %cst_25 {dimension_numbers = #tpu.dot_dimension_numbers<[1], [0], [0], [1], [0, 0, 1, 1], [], []>} : vector<4x8xbf16>, vector<8x128xbf16>, vector<4x128xf32> -> vector<4x128xf32>
    %29 = arith.addf %25, %28 : vector<4x128xf32>
    %30 = vector.broadcast %8 : vector<4x1xf32> to vector<4x128xf32>
    %31 = arith.addf %29, %30 : vector<4x128xf32>
    %c0_26 = arith.constant 0 : index
    %c0_27 = arith.constant 0 : index
    %c0_28 = arith.constant 0 : index
    %32 = vector.load %arg2[%c0_26, %c0_27, %c0_28] : memref<9x4x8xbf16, #tpu.memory_space<vmem>>, vector<1x4x8xbf16>
    %33 = vector.shape_cast %32 : vector<1x4x8xbf16> to vector<4x8xbf16>
    %cst_29 = arith.constant dense<0.000000e+00> : vector<4x128xf32>
    %34 = tpu.matmul %33, %7, %cst_29 {dimension_numbers = #tpu.dot_dimension_numbers<[1], [0], [0], [1], [0, 0, 1, 1], [], []>} : vector<4x8xbf16>, vector<8x128xbf16>, vector<4x128xf32> -> vector<4x128xf32>
    %c2_30 = arith.constant 2 : index
    %c0_31 = arith.constant 0 : index
    %c0_32 = arith.constant 0 : index
    %35 = vector.load %arg2[%c2_30, %c0_31, %c0_32] : memref<9x4x8xbf16, #tpu.memory_space<vmem>>, vector<1x4x8xbf16>
    %36 = vector.shape_cast %35 : vector<1x4x8xbf16> to vector<4x8xbf16>
    %cst_33 = arith.constant dense<0.000000e+00> : vector<4x128xf32>
    %37 = tpu.matmul %36, %5, %cst_33 {dimension_numbers = #tpu.dot_dimension_numbers<[1], [0], [0], [1], [0, 0, 1, 1], [], []>} : vector<4x8xbf16>, vector<8x128xbf16>, vector<4x128xf32> -> vector<4x128xf32>
    %38 = arith.addf %34, %37 : vector<4x128xf32>
    %c6 = arith.constant 6 : index
    %c0_34 = arith.constant 0 : index
    %c0_35 = arith.constant 0 : index
    %39 = vector.load %arg2[%c6, %c0_34, %c0_35] : memref<9x4x8xbf16, #tpu.memory_space<vmem>>, vector<1x4x8xbf16>
    %40 = vector.shape_cast %39 : vector<1x4x8xbf16> to vector<4x8xbf16>
    %cst_36 = arith.constant dense<0.000000e+00> : vector<4x128xf32>
    %41 = tpu.matmul %40, %3, %cst_36 {dimension_numbers = #tpu.dot_dimension_numbers<[1], [0], [0], [1], [0, 0, 1, 1], [], []>} : vector<4x8xbf16>, vector<8x128xbf16>, vector<4x128xf32> -> vector<4x128xf32>
    %42 = arith.addf %38, %41 : vector<4x128xf32>
    %c8 = arith.constant 8 : index
    %c0_37 = arith.constant 0 : index
    %c0_38 = arith.constant 0 : index
    %43 = vector.load %arg2[%c8, %c0_37, %c0_38] : memref<9x4x8xbf16, #tpu.memory_space<vmem>>, vector<1x4x8xbf16>
    %44 = vector.shape_cast %43 : vector<1x4x8xbf16> to vector<4x8xbf16>
    %cst_39 = arith.constant dense<0.000000e+00> : vector<4x128xf32>
    %45 = tpu.matmul %44, %1, %cst_39 {dimension_numbers = #tpu.dot_dimension_numbers<[1], [0], [0], [1], [0, 0, 1, 1], [], []>} : vector<4x8xbf16>, vector<8x128xbf16>, vector<4x128xf32> -> vector<4x128xf32>
    %46 = arith.addf %42, %45 : vector<4x128xf32>
    %47 = vector.broadcast %8 : vector<4x1xf32> to vector<4x128xf32>
    %48 = arith.addf %46, %47 : vector<4x128xf32>
    %49 = math.tanh %13 : vector<4x128xf32>
    %c0_40 = arith.constant 0 : index
    %c0_41 = arith.constant 0 : index
    %c0_42 = arith.constant 0 : index
    %50 = vector.load %arg6[%c0_40, %c0_41, %c0_42] : memref<4x4x128xf32, #tpu.memory_space<vmem>>, vector<1x4x128xf32>
    %51 = vector.shape_cast %50 : vector<1x4x128xf32> to vector<4x128xf32>
    %52 = vector.shape_cast %49 : vector<4x128xf32> to vector<1x4x128xf32>
    tpu.vector_store %arg6[%c0_40, %c0_41, %c0_42], %52 {strides = array<i32>} : memref<4x4x128xf32, #tpu.memory_space<vmem>>, vector<1x4x128xf32>,
    %53 = math.tanh %22 : vector<4x128xf32>
    %c1_43 = arith.constant 1 : index
    %c0_44 = arith.constant 0 : index
    %c0_45 = arith.constant 0 : index
    %54 = vector.load %arg6[%c1_43, %c0_44, %c0_45] : memref<4x4x128xf32, #tpu.memory_space<vmem>>, vector<1x4x128xf32>
    %55 = vector.shape_cast %54 : vector<1x4x128xf32> to vector<4x128xf32>
    %56 = vector.shape_cast %53 : vector<4x128xf32> to vector<1x4x128xf32>
    tpu.vector_store %arg6[%c1_43, %c0_44, %c0_45], %56 {strides = array<i32>} : memref<4x4x128xf32, #tpu.memory_space<vmem>>, vector<1x4x128xf32>,
    %57 = math.tanh %31 : vector<4x128xf32>
    %c2_46 = arith.constant 2 : index
    %c0_47 = arith.constant 0 : index
    %c0_48 = arith.constant 0 : index
    %58 = vector.load %arg6[%c2_46, %c0_47, %c0_48] : memref<4x4x128xf32, #tpu.memory_space<vmem>>, vector<1x4x128xf32>
    %59 = vector.shape_cast %58 : vector<1x4x128xf32> to vector<4x128xf32>
    %60 = vector.shape_cast %57 : vector<4x128xf32> to vector<1x4x128xf32>
    tpu.vector_store %arg6[%c2_46, %c0_47, %c0_48], %60 {strides = array<i32>} : memref<4x4x128xf32, #tpu.memory_space<vmem>>, vector<1x4x128xf32>,
    %61 = math.tanh %48 : vector<4x128xf32>
    %c3_49 = arith.constant 3 : index
    %c0_50 = arith.constant 0 : index
    %c0_51 = arith.constant 0 : index
    %62 = vector.load %arg6[%c3_49, %c0_50, %c0_51] : memref<4x4x128xf32, #tpu.memory_space<vmem>>, vector<1x4x128xf32>
    %63 = vector.shape_cast %62 : vector<1x4x128xf32> to vector<4x128xf32>
    %64 = vector.shape_cast %61 : vector<4x128xf32> to vector<1x4x128xf32>
    tpu.vector_store %arg6[%c3_49, %c0_50, %c0_51], %64 {strides = array<i32>} : memref<4x4x128xf32, #tpu.memory_space<vmem>>, vector<1x4x128xf32>,
    return
  }
  func.func @transform_0(%arg0: i32) -> (i32, i32, i32) {
    %c0_i32 = arith.constant 0 : i32
    %c0_i32_0 = arith.constant 0 : i32
    %c0_i32_1 = arith.constant 0 : i32
    %c0_i32_2 = arith.constant 0 : i32
    return %c0_i32, %c0_i32_0, %c0_i32_1 : i32, i32, i32
  }
  func.func @transform_1(%arg0: i32) -> (i32, i32, i32) {
    %c0_i32 = arith.constant 0 : i32
    %c0_i32_0 = arith.constant 0 : i32
    %c0_i32_1 = arith.constant 0 : i32
    %c0_i32_2 = arith.constant 0 : i32
    return %c0_i32, %c0_i32_0, %c0_i32_1 : i32, i32, i32
  }
  func.func @transform_2(%arg0: i32) -> (i32, i32) {
    %c0_i32 = arith.constant 0 : i32
    %c0_i32_0 = arith.constant 0 : i32
    %c0_i32_1 = arith.constant 0 : i32
    return %c0_i32, %c0_i32_0 : i32, i32
  }
  func.func @transform_3(%arg0: i32) -> (i32, i32) {
    %c0_i32 = arith.constant 0 : i32
    %c0_i32_0 = arith.constant 0 : i32
    %c0_i32_1 = arith.constant 0 : i32
    return %c0_i32, %c0_i32_0 : i32, i32
  }
  func.func @transform_4(%arg0: i32) -> (i32, i32) {
    %c0_i32 = arith.constant 0 : i32
    %c0_i32_0 = arith.constant 0 : i32
    %c0_i32_1 = arith.constant 0 : i32
    return %c0_i32, %c0_i32_0 : i32, i32
  }
  func.func @transform_5(%arg0: i32) -> (i32, i32, i32) {
    %c0_i32 = arith.constant 0 : i32
    %c0_i32_0 = arith.constant 0 : i32
    %c0_i32_1 = arith.constant 0 : i32
    %c0_i32_2 = arith.constant 0 : i32
    return %c0_i32, %c0_i32_0, %c0_i32_1 : i32, i32, i32
  }
}

</mosaic_0001>

<bundles_post_ra>
// kernel: fwd.6
= control target key start
LH: loop header
LB: loop body
LE: loop exit
PB: predicated region body
PF: predicated region fallthrough
CT: control target
= control target key end

     0   :  { %vm52_vm0 = vcmask 1041408   ;;  %v157_v0 = vmov 0.0   ;;  %vm158_vm1 = vmmov 0   ;;  %v159_v5 = vmov 0   ;;  %s214_s0 = inlined_call_operand.vmem [shape: bf16[36,128], index: 0, kind: input, shape index: {}]   ;;  %s215_s2 = inlined_call_operand.vmem [shape: f32[8,1], index: 2, kind: input, shape index: {}]   ;;  %s216_s1 = inlined_call_operand.vmem [shape: bf16[8,36], index: 1, kind: input, shape index: {}]   ;;  %s217_s3 = inlined_call_operand.vmem [shape: f32[8,1], index: 3, kind: input, shape index: {}]   ;;  %s218_s4 = inlined_call_operand.vmem [shape: f32[8,1], index: 4, kind: input, shape index: {}]   ;;  %s219_s5 = inlined_call_operand.vmem [shape: f32[8,128], index: 5, kind: output, shape index: {}]  }
   0x1   :  { %137 = vmatprep.subr.bf16.mxu0 %v157_v0  ;;  %v152_v1 = vld [vmem:[%s214_s0 + $0x10] ss:$0 sps:$4 sm:$0x33]   ;;  %143 = vmatprep.mubr.msk.bf16.mxu0 %vm158_vm1, %v157_v0  ;;  %v153_v3 = vld [vmem:[%s214_s0 + $0x8] sm:$0xff]   ;;  %v27_v4 = vld [vmem:[%s215_s2] sm:$0xff]  ;;  %vm48_vm2 = vcmask 293888  }
   0x2   :  { %v54_v2 = vsel %vm52_vm0, %v152_v1, 0  ;;  %150 = vset.pattern.permute.xlu0 %v159_v5  ;;  %151 = vset.pattern.permute.xlu1 %v159_v5  ;;  %v154_v6 = vld [vmem:[%s214_s0] sm:$0xff]  }
   0x3   :  { %138 = vmatpush3.bf16.msra.mxu0 %v54_v2  ;;  %30 = vperm.xlu0 %150, %v27_v4   ;;  %v21_v7 = vld [vmem:[%s216_s1] sm:$0xf] }
   0x4   :  { %139 = vmatprep.subr.bf16.mxu0 %v157_v0  ;;  %v106_v21 = vld [vmem:[%s217_s3] sm:$0xff] }
   0x5   :  { %v114_v24 = vld [vmem:[%s218_s4] sm:$0xff] }
   0x7   :  { %140 = vmatpush3.bf16.msra.mxu0 %v153_v3 }
   0x8   :  { %141 = vmatprep.subr.bf16.mxu0 %v157_v0 }
   0xb   :  { %142 = vmatpush3.bf16.msra.mxu0 %v154_v6 }
   0xe   :  { %144 = vmatmul.mubr.msk.bf16.vlgmr.msra.gmra.mxu0 %vm48_vm2, %v21_v7 }
  0x7e   :  { %v31_v8 = vpop.permute.xlu0 %30 }
  0xce   :  { %v90_v9 = vpop.f32.mrf.mxu0 }
  0xcf   :  { %v91_v10 = vadd.f32 %v90_v9, %v31_v8 }
  0xd0   :  { %v145_v11 = vpop.f32.mrf.mxu0 }
  0xd1   :  { %96 = vadd.xlane.f32.xlu0 %v91_v10 }
  0xd2   :  { %v93_v12 = vpop.f32.mrf.mxu0 }
  0xd4   :  { %v146_v13 = vpop.f32.mrf.mxu0 }
 0x15a   :  { %v97_v14 = vpop.xlane.xlu0 %96 }
 0x15b   :  { %v98_v15 = vmul.f32 0.0078125, %v97_v14 }
 0x15d   :  { %v99_v16 = vsub.f32 %v91_v10, %v98_v15 }
 0x15f   :  { %v100_v17 = vmul.f32 %v99_v16, %v99_v16 }
 0x161   :  { %101 = vadd.xlane.f32.xlu1 %v100_v17 }
 0x1ea   :  { %v102_v18 = vpop.xlane.xlu1 %101 }
 0x1eb   :  { %v103_v19 = vmul.f32 0.0078125, %v102_v18 }
 0x1ed   :  { %v104_v20 = vadd.f32 1e-05, %v103_v19 }
 0x1ef   :  { %155 = vrsqrt.f32 %v104_v20 }
 0x1fc   :  { %v156_v22 = vpop.eup %155 }
 0x1fd   :  { %v107_v23 = vmul.f32 %v156_v22, %v106_v21 }
 0x1ff   :  { %110 = vperm.xlu1 %151, %v107_v23  }
 0x203   :  { %117 = vperm.xlu1 %151, %v114_v24  }
 0x27a   :  { %v111_v25 = vpop.permute.xlu1 %110 }
 0x27b   :  { %v113_v26 = vmul.f32 %v111_v25, %v99_v16 }
 0x27e   :  { %v118_v27 = vpop.permute.xlu1 %117 }
 0x27f   :  { %v120_v28 = vadd.f32 %v118_v27, %v113_v26 }
 0x281   :  { %vm121_vm3 = vcmp.ge.f32.partialorder %v120_v28, 0.0  ;;  %v122_v29 = vmul.f32 0.01, %v120_v28 }
 0x283   :  { %v123_v30 = vsel %vm121_vm3, %v120_v28, %v122_v29 }
 0x284   :  { %124 = vst [vmem:[%s219_s5] sm:$0xff] %v123_v30 }

// kernel: fwd.7
= control target key start
LH: loop header
LB: loop body
LE: loop exit
PB: predicated region body
PF: predicated region fallthrough
CT: control target
= control target key end

     0   :  { %vm80_vm0 = vcmask 1043456   ;;  %v234_v0 = vmov 0.0   ;;  %vm235_vm1 = vmmov 0   ;;  %v236_v3 = vmov 0   ;;  %s315_s0 = inlined_call_operand.vmem [shape: bf16[72,32], index: 0, kind: input, shape index: {}]   ;;  %s316_s2 = inlined_call_operand.vmem [shape: f32[16,1], index: 2, kind: input, shape index: {}]   ;;  %s317_s1 = inlined_call_operand.vmem [shape: bf16[16,72], index: 1, kind: input, shape index: {}]   ;;  %s318_s4 = inlined_call_operand.vmem [shape: f32[16,1], index: 4, kind: input, shape index: {}]   ;;  %s319_s3 = inlined_call_operand.vmem [shape: f32[16,1], index: 3, kind: input, shape index: {}]   ;;  %s320_s5 = inlined_call_operand.vmem [shape: f32[16,32], index: 5, kind: output, shape index: {}]  }
   0x1   :  { %205 = vmatprep.subr.bf16.mxu0 %v234_v0  ;;  %v224_v1 = vld [vmem:[%s315_s0 + $0x20] ss:$0 sps:$4 sm:$0xff]   ;;  %215 = vmatprep.mubr.msk.bf16.mxu0 %vm235_vm1, %v234_v0  ;;  %v225_v4 = vld [vmem:[%s315_s0 + $0x18] sm:$0xff]   ;;  %v226_v6 = vld [vmem:[%s315_s0 + $0x10] sm:$0xff]   ;;  %vm76_vm2 = vcmask 588800   ;;  %vm125_vm3 = vcmask 261120  }
   0x2   :  { %v82_v2 = vsel %vm80_vm0, %v224_v1, 0  ;;  %222 = vset.pattern.permute.xlu0 %v236_v3  ;;  %223 = vset.pattern.permute.xlu1 %v236_v3  ;;  %v32_v5 = vld [vmem:[%s316_s2] sm:$0xff]  ;;  %v33_v7 = vld [vmem:[%s316_s2 + $0x8] sm:$0xff] }
   0x3   :  { %206 = vmatpush3.bf16.msra.mxu0 %v82_v2  ;;  %36 = vperm.xlu0 %222, %v32_v5   ;;  %v227_v8 = vld [vmem:[%s315_s0 + $0x8] sm:$0xff]   ;;  %v228_v9 = vld [vmem:[%s315_s0] sm:$0xff]  }
   0x4   :  { %207 = vmatprep.subr.bf16.mxu0 %v234_v0  ;;  %v229_v10 = vld [vmem:[%s317_s1] sm:$0xff]   ;;  %v151_v41 = vld [vmem:[%s319_s3 + $0x8] sm:$0xff] }
   0x5   :  { %v166_v31 = vld [vmem:[%s318_s4] sm:$0xff]  ;;  %v167_v44 = vld [vmem:[%s318_s4 + $0x8] sm:$0xff] }
   0x6   :  { %v150_v38 = vld [vmem:[%s319_s3] sm:$0xff] }
   0x7   :  { %208 = vmatpush3.bf16.msra.mxu0 %v225_v4  ;;  %41 = vperm.xlu0 %222, %v33_v7  }
   0x8   :  { %209 = vmatprep.subr.bf16.mxu0 %v234_v0 }
   0xb   :  { %210 = vmatpush3.bf16.msra.mxu0 %v226_v6 }
   0xc   :  { %211 = vmatprep.subr.bf16.mxu0 %v234_v0 }
   0xf   :  { %212 = vmatpush3.bf16.msra.mxu0 %v227_v8 }
  0x10   :  { %213 = vmatprep.subr.bf16.mxu0 %v234_v0 }
  0x13   :  { %214 = vmatpush3.bf16.msra.mxu0 %v228_v9 }
  0x16   :  { %216 = vmatmul.mubr.msk.bf16.vlgmr.msra.gmra.mxu0 %vm76_vm2, %v229_v10 }
  0x7e   :  { %v37_v11 = vpop.permute.xlu0 %36 }
  0x82   :  { %v42_v16 = vpop.permute.xlu0 %41 }
  0xd6   :  { %v118_v12 = vpop.f32.mrf.mxu0 }
  0xd7   :  { %v119_v13 = vadd.f32 %v118_v12, %v37_v11 }
  0xd8   :  { %v217_v14 = vpop.f32.mrf.mxu0 }
  0xd9   :  { %v126_v15 = vsel %vm125_vm3, %v119_v13, 0.0 }
  0xda   :  { %127 = vadd.xlane.f32.xlu1 %v126_v15  ;;  %v121_v17 = vpop.f32.mrf.mxu0 }
  0xdb   :  { %v122_v18 = vadd.f32 %v121_v17, %v42_v16 }
  0xdc   :  { %v218_v19 = vpop.f32.mrf.mxu0 }
  0xdd   :  { %v129_v20 = vsel %vm125_vm3, %v122_v18, 0.0 }
  0xde   :  { %130 = vadd.xlane.f32.xlu1 %v129_v20 }
 0x163   :  { %v128_v21 = vpop.xlane.xlu1 %127 }
 0x164   :  { %v132_v22 = vmul.f32 0.03125, %v128_v21 }
 0x166   :  { %v134_v23 = vsub.f32 %v119_v13, %v132_v22 }
 0x167   :  { %v131_v24 = vpop.xlane.xlu1 %130 }
 0x168   :  { %v133_v25 = vmul.f32 0.03125, %v131_v24  ;;  %v136_v26 = vmul.f32 %v134_v23, %v134_v23 }
 0x16a   :  { %v135_v27 = vsub.f32 %v122_v18, %v133_v25  ;;  %v138_v28 = vsel %vm125_vm3, %v136_v26, 0.0 }
 0x16b   :  { %139 = vadd.xlane.f32.xlu0 %v138_v28 }
 0x16c   :  { %v137_v29 = vmul.f32 %v135_v27, %v135_v27 }
 0x16e   :  { %v141_v30 = vsel %vm125_vm3, %v137_v29, 0.0 }
 0x16f   :  { %142 = vadd.xlane.f32.xlu1 %v141_v30 }
 0x180   :  { %170 = vperm.xlu1 %223, %v166_v31  }
 0x1f4   :  { %v140_v32 = vpop.xlane.xlu0 %139 }
 0x1f5   :  { %v144_v33 = vmul.f32 0.03125, %v140_v32 }
 0x1f7   :  { %v146_v34 = vadd.f32 1e-05, %v144_v33 }
 0x1f8   :  { %v143_v35 = vpop.xlane.xlu1 %142 }
 0x1f9   :  { %230 = vrsqrt.f32 %v146_v34  ;;  %v145_v36 = vmul.f32 0.03125, %v143_v35 }
 0x1fb   :  { %v147_v37 = vadd.f32 1e-05, %v145_v36 }
 0x1fc   :  { %v171_v45 = vpop.permute.xlu1 %170 }
 0x1fd   :  { %232 = vrsqrt.f32 %v147_v37 }
 0x206   :  { %v231_v39 = vpop.eup %230 }
 0x207   :  { %v152_v40 = vmul.f32 %v231_v39, %v150_v38 }
 0x209   :  { %156 = vperm.xlu1 %223, %v152_v40  }
 0x20a   :  { %v233_v42 = vpop.eup %232 }
 0x20b   :  { %v153_v43 = vmul.f32 %v233_v42, %v151_v41 }
 0x20d   :  { %161 = vperm.xlu1 %223, %v153_v43  }
 0x211   :  { %175 = vperm.xlu1 %223, %v167_v44  }
 0x284   :  { %v157_v46 = vpop.permute.xlu1 %156 }
 0x285   :  { %v164_v47 = vmul.f32 %v157_v46, %v134_v23 }
 0x287   :  { %v178_v48 = vadd.f32 %v171_v45, %v164_v47 }
 0x288   :  { %v162_v49 = vpop.permute.xlu1 %161 }
 0x289   :  { %vm180_vm4 = vcmp.ge.f32.partialorder %v178_v48, 0.0  ;;  %v182_v50 = vmul.f32 0.01, %v178_v48  ;;  %v165_v52 = vmul.f32 %v162_v49, %v135_v27 }
 0x28b   :  { %v184_v51 = vsel %vm180_vm4, %v178_v48, %v182_v50 }
 0x28c   :  { %186 = vst.msk [vmem:[%s320_s5] sm:$0xff] %vm125_vm3, %v184_v51  ;;  %v176_v53 = vpop.permute.xlu1 %175 }
 0x28d   :  { %v179_v54 = vadd.f32 %v176_v53, %v165_v52 }
 0x28f   :  { %vm181_vm5 = vcmp.ge.f32.partialorder %v179_v54, 0.0  ;;  %v183_v55 = vmul.f32 0.01, %v179_v54 }
 0x291   :  { %v185_v56 = vsel %vm181_vm5, %v179_v54, %v183_v55 }
 0x292   :  { %187 = vst.msk [vmem:[%s320_s5 + $0x8] sm:$0xff] %vm125_vm3, %v185_v56 }

// kernel: fwd.9
= control target key start
LH: loop header
LB: loop body
LE: loop exit
PB: predicated region body
PF: predicated region fallthrough
CT: control target
= control target key end

     0   :  { %vm38_vm0 = vcmask 1043456   ;;  %v112_v1 = vmov 0   ;;  %vm34_vm1 = vcmask 64512   ;;  %v19_v6 = vlaneseq  ;;  %s145_s1 = inlined_call_operand.vmem [shape: bf16[8,256], index: 1, kind: input, shape index: {}]   ;;  %s146_s0 = inlined_call_operand.vmem [shape: bf16[2,8], index: 0, kind: input, shape index: {}]   ;;  %s147_s2 = inlined_call_operand.vmem [shape: f32[1,256], index: 2, kind: input, shape index: {}]   ;;  %s148_s3 = inlined_call_operand.vmem [shape: f32[2,256], index: 3, kind: output, shape index: {}]  }
   0x1   :  { %v16_v0 = vld [vmem:[%s145_s1] sm:$0xff]  ;;  %77 = vmatprep.mubr.bf16.mxu0 %v112_v1 }
   0x2   :  { %v105_v2 = vcombine.high %v16_v0, %v16_v0  ;;  %v104_v3 = vcombine.low %v16_v0, %v16_v0  ;;  %v15_v5 = vld [vmem:[%s146_s0] sm:$0x1]  ;;  %v20_v7 = vshrl.u32 %v19_v6, 7 }
   0x3   :  { %v17_v9 = vld [vmem:[%s147_s2] sm:$0x3] }
   0x4   :  { %106 = vmatprep.subr.msk.bf16.mxu0 %vm38_vm0, %v105_v2  ;;  %v40_v4 = vsel %vm38_vm0, %v104_v3, 0  ;;  %v21_v8 = vsub.s32 0, %v20_v7  ;;  %v25_v10 = vsub.s32 1, %v20_v7 }
   0x5   :  { %60 = vmatpush1.bf16.msra.mxu0 %v40_v4 }
   0x6   :  { %v22_v11 = vrot.slane %v17_v9, %v21_v8  ;;  %v26_v12 = vrot.slane %v17_v9, %v25_v10 }
   0x8   :  { %107 = vmatmul.mubr.msk.bf16.vlgmr.msra.gmra.mxu0 %vm34_vm1, %v15_v5 }
  0xc8   :  { %v79_v13 = vpop.f32.mrf.mxu0 }
  0xc9   :  { %v80_v14 = vadd.f32 %v79_v13, %v22_v11 }
  0xca   :  { %v81_v15 = vpop.f32.mrf.mxu0 }
  0xcb   :  { %v82_v16 = vadd.f32 %v81_v15, %v26_v12  ;;  %v86_v18 = vmax.f32 %v80_v14, 0.0 }
  0xcc   :  { %v83_v17 = vpop.f32.mrf.mxu0 }
  0xcd   :  { %v87_v19 = vmax.f32 %v82_v16, 0.0 }
  0xce   :  { %v84_v20 = vpop.f32.mrf.mxu0 }
  0xcf   :  { %v90_v21 = vcombine.low %v86_v18, %v87_v19 }
  0xd1   :  { %108 = vst.sshfl [vmem:[%s148_s3] sm:$0x33 pattern:$0x76325410] %v90_v21 }

// kernel: fwd.8
= control target key start
LH: loop header
LB: loop body
LE: loop exit
PB: predicated region body
PF: predicated region fallthrough
CT: control target
= control target key end

     0   :  { %14 = vsyncpa [#allocation3], 0  ;;  %v81_v23 = vlaneseq  ;;  %v607_v28 = vmov 1966171168   ;;  %s775_s0 = inlined_call_operand.vmem [shape: bf16[2,256], index: 0, kind: input, shape index: {}]   ;;  %s776_s1 = inlined_call_operand.vmem [shape: bf16[256,8], index: 1, kind: input, shape index: {}]   ;;  %s777_s2 = inlined_call_operand.vmem [shape: bf16[256,8], index: 2, kind: input, shape index: {}]   ;;  %s778_s3 = inlined_call_operand.vmem [shape: f32[1,8], index: 3, kind: input, shape index: {}]   ;;  %s779_s4 = inlined_call_operand.vmem [shape: f32[1,8], index: 4, kind: input, shape index: {}]   ;;  %s780_s5 = inlined_call_operand.vmem [shape: f32[2,8], index: 5, kind: input, shape index: {}]   ;;  %s781_s6 = inlined_call_operand.hbm [shape: f32[2,8], index: 6, kind: output, shape index: {0}]   ;;  %s782_s7 = inlined_call_operand.hbm [shape: f32[2,8], index: 7, kind: output, shape index: {1}]   ;;  %s783_s8 = inlined_call_operand.vmem [shape: f32[2,8], index: 8, kind: output, shape index: {2}]  }
   0x1   :  { %v529_v0 = vld [vmem:[%s777_s2 + $0x78] sm:$0xff]   ;;  %v531_v2 = vld [vmem:[%s777_s2 + $0x70] sm:$0xff]   ;;  %v533_v4 = vld [vmem:[%s777_s2 + $0x68] sm:$0xff]   ;;  %v79_v29 = vunpack.c.l.s4 %v607_v28 }
   0x2   :  { %v530_v1 = vld [vmem:[%s777_s2 + $0x38] sm:$0xff]   ;;  %504 = vmatprep.subr.bf16.mxu1 %v529_v0  ;;  %v532_v3 = vld [vmem:[%s777_s2 + $0x30] sm:$0xff]   ;;  %v534_v5 = vld [vmem:[%s777_s2 + $0x28] sm:$0xff]   ;;  %v82_v30 = vshrl.u32 %v81_v23, 7 }
   0x3   :  { %505 = vmatpush3.bf16.msra.mxu1 %v530_v1  ;;  %v535_v6 = vld [vmem:[%s777_s2 + $0x60] sm:$0xff]   ;;  %v537_v7 = vld [vmem:[%s776_s1 + $0x78] sm:$0xff]   ;;  %v541_v11 = vld [vmem:[%s776_s1 + $0x70] sm:$0xff]   ;;  %v80_v34 = vunpack.c.0.s8 %v79_v29 }
   0x4   :  { %506 = vmatprep.subr.bf16.mxu1 %v531_v2  ;;  %v538_v8 = vld [vmem:[%s776_s1 + $0x38] sm:$0xff]   ;;  %v536_v9 = vld [vmem:[%s777_s2 + $0x20] sm:$0xff]   ;;  %482 = vmatprep.subr.bf16.mxu0 %v537_v7  ;;  %v542_v12 = vld [vmem:[%s776_s1 + $0x30] sm:$0xff]  }
   0x5   :  { %483 = vmatpush3.bf16.msra.mxu0 %v538_v8  ;;  %v539_v10 = vld [vmem:[%s777_s2 + $0x58] sm:$0xff]   ;;  %v543_v14 = vld [vmem:[%s777_s2 + $0x50] sm:$0xff]   ;;  %v545_v15 = vld [vmem:[%s776_s1 + $0x68] sm:$0xff]   ;;  %v83_v36 = vsub.s32 %v80_v34, %v82_v30 }
   0x6   :  { %v540_v13 = vld [vmem:[%s777_s2 + $0x18] sm:$0xff]   ;;  %484 = vmatprep.subr.bf16.mxu0 %v541_v11  ;;  %v546_v16 = vld [vmem:[%s776_s1 + $0x28] sm:$0xff]   ;;  %v544_v17 = vld [vmem:[%s777_s2 + $0x10] sm:$0xff]  }
   0x7   :  { %507 = vmatpush3.bf16.msra.mxu1 %v532_v3  ;;  %v547_v18 = vld [vmem:[%s777_s2 + $0x48] sm:$0xff]   ;;  %v549_v19 = vld [vmem:[%s776_s1 + $0x60] sm:$0xff]   ;;  %v553_v24 = vld [vmem:[%s776_s1 + $0x58] sm:$0xff]  }
   0x8   :  { %508 = vmatprep.subr.bf16.mxu1 %v533_v4  ;;  %v550_v20 = vld [vmem:[%s776_s1 + $0x20] sm:$0xff]   ;;  %v548_v21 = vld [vmem:[%s777_s2 + $0x8] sm:$0xff]   ;;  %v554_v26 = vld [vmem:[%s776_s1 + $0x18] sm:$0xff]  }
   0x9   :  { %485 = vmatpush3.bf16.msra.mxu0 %v542_v12  ;;  %v551_v22 = vld [vmem:[%s777_s2 + $0x40] sm:$0xff]   ;;  %v555_v31 = vld [vmem:[%s776_s1 + $0x50] sm:$0xff]   ;;  %v557_v35 = vld [vmem:[%s776_s1 + $0x48] sm:$0xff]  }
   0xa   :  { %486 = vmatprep.subr.bf16.mxu0 %v545_v15  ;;  %v552_v25 = vld [vmem:[%s777_s2] sm:$0xff]   ;;  %v556_v32 = vld [vmem:[%s776_s1 + $0x10] sm:$0xff]   ;;  %v558_v37 = vld [vmem:[%s776_s1 + $0x8] sm:$0xff]  }
   0xb   :  { %509 = vmatpush3.bf16.msra.mxu1 %v534_v5  ;;  %v448_v27 = vld.sshfl [vmem:[%s775_s0] sm:$0x11 pattern:$0x75316420] }
   0xc   :  { %510 = vmatprep.subr.bf16.mxu1 %v535_v6  ;;  %v77_v33 = vcombine.high %v448_v27, %v448_v27  ;;  %v559_v38 = vld [vmem:[%s776_s1 + $0x40] sm:$0xff]   ;;  %v84_v40 = vrot.slane %v448_v27, %v83_v36 }
   0xd   :  { %487 = vmatpush3.bf16.msra.mxu0 %v546_v16 }
   0xe   :  { %488 = vmatprep.subr.bf16.mxu0 %v549_v19  ;;  %v91_v39 = vrot.slane %v77_v33, %v83_v36 }
   0xf   :  { %511 = vmatpush3.bf16.msra.mxu1 %v536_v9 }
  0x10   :  { %512 = vmatprep.subr.bf16.mxu1 %v539_v10 }
  0x11   :  { %489 = vmatpush3.bf16.msra.mxu0 %v550_v20 }
  0x12   :  { %490 = vmatprep.subr.bf16.mxu0 %v553_v24 }
  0x13   :  { %513 = vmatpush3.bf16.msra.mxu1 %v540_v13 }
  0x14   :  { %514 = vmatprep.subr.bf16.mxu1 %v543_v14 }
  0x15   :  { %491 = vmatpush3.bf16.msra.mxu0 %v554_v26 }
  0x16   :  { %492 = vmatprep.subr.bf16.mxu0 %v555_v31 }
  0x17   :  { %515 = vmatpush3.bf16.msra.mxu1 %v544_v17 }
  0x18   :  { %516 = vmatprep.subr.bf16.mxu1 %v547_v18 }
  0x19   :  { %493 = vmatpush3.bf16.msra.mxu0 %v556_v32 }
  0x1a   :  { %494 = vmatprep.subr.bf16.mxu0 %v557_v35 }
  0x1b   :  { %517 = vmatpush3.bf16.msra.mxu1 %v548_v21 }
  0x1c   :  { %518 = vmatprep.subr.bf16.mxu1 %v551_v22 }
  0x1f   :  { %519 = vmatpush3.bf16.msra.mxu1 %v552_v25 }
  0x20   :  { %15 = vsyncpa [#allocation5], 0  ;;  %397 = vmatprep.mubr.bf16.mxu1 %v91_v39  ;;  %495 = vmatpush3.bf16.msra.mxu0 %v558_v37  ;;  %v560_v41 = vld [vmem:[%s776_s1] sm:$0xff]   ;;  %s608_s27 = smov [#allocation4]   ;;  %vm405_vm0 = vcmask 58368   ;;  %s609_s1 = smov [#allocation2]  }
  0x21   :  { %496 = vmatprep.subr.bf16.mxu0 %v559_v38  ;;  %222 = vmatprep.mubr.bf16.mxu0 %v91_v39  ;;  %v465_v43 = vld [vmem:[%s779_s4] ss:$0 sm:$0xff]  ;;  %s431_s28 = sshll.u32 %s608_s27, 4  ;;  %s421_s29 = sshll.u32 %s609_s1, 4  ;;  %s432_s28 = int_to_ptr.vmem [resolvable:$true] %s431_s28  ;;  %s422_s29 = int_to_ptr.vmem [resolvable:$true] %s421_s29 }
  0x22   :  { %398 = vmatmul.mubr.bf16.vlgmr.msra.gmra.mxu1 %v84_v40  ;;  %v447_v52 = vld [vmem:[%s778_s3] ss:$0 sm:$0xff]  ;;  %s563_s4 = scalar_lea.vmem %s432_s28, 32  ;;  %p568_p1 = scmp.lt.s32.totalorder %s432_s28, %s432_s28 }
  0x23   :  { %p564_p0 = scmp.ne.s32.totalorder %s432_s28, %s563_s4  ;;  %p569_p2 = scmp.lt.s32.totalorder %s563_s4, %s563_s4 }
  0x24   :  { %497 = vmatpush3.bf16.msra.mxu0 %v560_v41 }
  0x25   :  { %p570_p3 = por %p569_p2, %p568_p1 }
  0x27   :  { %223 = vmatmul.mubr.bf16.vlgmr.msra.gmra.mxu0 %v84_v40  ;;  %p571_p4 = pnand %p570_p3, %p564_p0 }
  0xe2   :  { %v520_v42 = vpop.f32.mrf.mxu1 }
  0xe4   :  { %v521_v44 = vpop.f32.mrf.mxu1 }
  0xe5   :  { %v522_v45 = vadd.f32 %v521_v44, %v520_v42 }
  0xe6   :  { %v523_v46 = vpop.f32.mrf.mxu1 }
  0xe7   :  { %v400_v47 = vadd.f32 %v522_v45, %v465_v43  ;;  %v498_v49 = vpop.f32.mrf.mxu0 }
  0xe8   :  { %v524_v48 = vpop.f32.mrf.mxu1 }
  0xe9   :  { %v409_v50 = vmul.f32 0.5, %v400_v47  ;;  %407 = vst.msk [vmem:[#allocation4] sm:$0x3] %vm405_vm0, %v400_v47  ;;  %v499_v51 = vpop.f32.mrf.mxu0 }
  0xea   :  { %574 = shalt.err (!%p571_p4)
}
  0xeb   :  { %434 = dma.vmem_to_hbm [thread:$0]  %s432_s28, 32, %s782_s7, [#allocation5]   ;;  %v410_v53 = vmul.f32 1.442695, %v409_v50  ;;  %v500_v54 = vadd.f32 %v499_v51, %v498_v49  ;;  %v501_v55 = vpop.f32.mrf.mxu0 }
  0xec   :  { %s583_s3 = scalar_lea.vmem %s422_s29, 32  ;;  %p588_p6 = scmp.lt.s32.totalorder %s422_s29, %s422_s29 }
  0xed   :  { %561 = vpow2.f32 %v410_v53  ;;  %v225_v56 = vadd.f32 %v500_v54, %v447_v52  ;;  %v502_v57 = vpop.f32.mrf.mxu0  ;;  %p584_p5 = scmp.ne.s32.totalorder %s422_s29, %s583_s3  ;;  %p589_p7 = scmp.lt.s32.totalorder %s583_s3, %s583_s3 }
  0xef   :  { %406 = vst.msk [vmem:[#allocation2] sm:$0x3] %vm405_vm0, %v225_v56  ;;  %p590_p8 = por %p589_p7, %p588_p6 }
  0xf1   :  { %p591_p9 = pnand %p590_p8, %p584_p5 }
  0xf3   :  { %594 = shalt.err (!%p591_p9)
}
  0xf4   :  { %424 = dma.vmem_to_hbm [thread:$0]  %s422_s29, 32, %s781_s6, [#allocation3]   ;;  %v408_v58 = vld [vmem:[%s780_s5] sm:$0x3] }
  0xfa   :  { %v562_v59 = vpop.eup %561 }
  0xfb   :  { %v412_v60 = vmul.f32 %v562_v59, %v408_v58 }
  0xfd   :  { %v413_v61 = vadd.f32 %v412_v60, %v225_v56 }
  0xff   :  { %414 = vst.msk [vmem:[%s783_s8] sm:$0x3] %vm405_vm0, %v413_v61 }
 0x100   :  { %603 = dma.done.wait [#allocation3], 32  }
 0x101   :  { %604 = vsyncadd [#allocation3], 4294967264 }
 0x102   :  { %605 = dma.done.wait [#allocation5], 32  }
 0x103   :  { %606 = vsyncadd [#allocation5], 4294967264 }
 0x104   :  { %445 = vsyncpa [#allocation3], 1 }
 0x105   :  { %446 = vsyncpa [#allocation5], 1 }

// kernel: fwd.11
= control target key start
LH: loop header
LB: loop body
LE: loop exit
PB: predicated region body
PF: predicated region fallthrough
CT: control target
= control target key end

     0   :  { %vm40_vm0 = vcmask 1043456   ;;  %v579_v0 = vmov 0.0   ;;  %vm580_vm1 = vmmov 0   ;;  %vm36_vm2 = vcmask 64512   ;;  %s688_s3 = inlined_call_operand.vmem [shape: f32[4,1], index: 3, kind: input, shape index: {}]   ;;  %s689_s4 = inlined_call_operand.vmem [shape: f32[4,1], index: 4, kind: input, shape index: {}]   ;;  %s690_s0 = inlined_call_operand.vmem [shape: bf16[4,8,128], index: 0, kind: input, shape index: {}]   ;;  %s691_s1 = inlined_call_operand.vmem [shape: bf16[9,4,8], index: 1, kind: input, shape index: {}]   ;;  %s692_s2 = inlined_call_operand.vmem [shape: f32[4,1], index: 2, kind: input, shape index: {}]   ;;  %s693_s5 = inlined_call_operand.vmem [shape: f32[4,4,128], index: 5, kind: output, shape index: {}]  }
   0x1   :  { %513 = vmatprep.subr.bf16.mxu0 %v579_v0  ;;  %v21_v1 = vld [vmem:[%s690_s0] sm:$0xf]  ;;  %519 = vmatprep.subr.bf16.mxu1 %v579_v0  ;;  %v472_v3 = vld [vmem:[%s690_s0 + $0x4] sm:$0xf]  ;;  %v475_v4 = vld [vmem:[%s691_s1 + $0x8] sm:$0x3] }
   0x2   :  { %v42_v2 = vsel %vm40_vm0, %v21_v1, 0  ;;  %515 = vmatprep.mubr.msk.bf16.mxu0 %vm580_vm1, %v579_v0  ;;  %521 = vmatprep.mubr.msk.bf16.mxu1 %vm580_vm1, %v579_v0  ;;  %v478_v5 = vld [vmem:[%s691_s1 + $0xa] sm:$0x3]  ;;  %v135_v6 = vsel %vm40_vm0, %v472_v3, 0  ;;  %v581_v7 = vmov 0  }
   0x3   :  { %514 = vmatpush3.bf16.msra.mxu0 %v42_v2  ;;  %520 = vmatpush3.bf16.msra.mxu1 %v42_v2  ;;  %v28_v8 = vld [vmem:[%s692_s2] sm:$0xf]  ;;  %v473_v9 = vld [vmem:[%s690_s0 + $0x8] sm:$0xf]  ;;  %v477_v10 = vld [vmem:[%s691_s1 + $0x6] sm:$0x3] }
   0x4   :  { %525 = vmatprep.subr.bf16.mxu0 %v579_v0  ;;  %531 = vmatprep.subr.bf16.mxu1 %v579_v0  ;;  %v482_v11 = vld [vmem:[%s691_s1 + $0xe] sm:$0x3]  ;;  %v229_v12 = vsel %vm40_vm0, %v473_v9, 0  ;;  %v481_v14 = vld [vmem:[%s691_s1 + $0x2] sm:$0x3] }
   0x5   :  { %570 = vset.pattern.permute.xlu0 %v581_v7  ;;  %v474_v13 = vld [vmem:[%s690_s0 + $0xc] sm:$0xf]  ;;  %v485_v15 = vld [vmem:[%s691_s1 + $0x4] sm:$0x3]  ;;  %v272_v17 = vld [vmem:[%s691_s1] sm:$0x3] }
   0x6   :  { %516 = vmatmul.mubr.msk.bf16.vlgmr.msra.gmra.mxu0 %vm36_vm2, %v475_v4  ;;  %522 = vmatmul.mubr.msk.bf16.vlgmr.msra.gmra.mxu1 %vm36_vm2, %v478_v5  ;;  %v322_v16 = vsel %vm40_vm0, %v474_v13, 0  ;;  %v488_v18 = vld [vmem:[%s691_s1 + $0xc] sm:$0x3]  ;;  %v490_v19 = vld [vmem:[%s691_s1 + $0x10] sm:$0x3] }
   0x7   :  { %526 = vmatpush3.bf16.msra.mxu0 %v135_v6  ;;  %532 = vmatpush3.bf16.msra.mxu1 %v42_v2 }
   0x8   :  { %527 = vmatprep.mubr.msk.bf16.mxu0 %vm580_vm1, %v579_v0  ;;  %533 = vmatprep.mubr.msk.bf16.mxu1 %vm580_vm1, %v579_v0 }
   0x9   :  { %537 = vmatprep.subr.bf16.mxu0 %v579_v0  ;;  %543 = vmatprep.subr.bf16.mxu1 %v579_v0 }
   0xa   :  { %33 = vperm.xlu0 %570, %v28_v8  }
   0xe   :  { %528 = vmatmul.mubr.msk.bf16.vlgmr.msra.gmra.mxu0 %vm36_vm2, %v477_v10  ;;  %534 = vmatmul.mubr.msk.bf16.vlgmr.msra.gmra.mxu1 %vm36_vm2, %v482_v11 }
   0xf   :  { %538 = vmatpush3.bf16.msra.mxu0 %v229_v12  ;;  %544 = vmatpush3.bf16.msra.mxu1 %v229_v12 }
  0x10   :  { %539 = vmatprep.mubr.msk.bf16.mxu0 %vm580_vm1, %v579_v0  ;;  %545 = vmatprep.mubr.msk.bf16.mxu1 %vm580_vm1, %v579_v0 }
  0x11   :  { %549 = vmatprep.subr.bf16.mxu0 %v579_v0  ;;  %555 = vmatprep.subr.bf16.mxu1 %v579_v0 }
  0x16   :  { %540 = vmatmul.mubr.msk.bf16.vlgmr.msra.gmra.mxu0 %vm36_vm2, %v481_v14  ;;  %546 = vmatmul.mubr.msk.bf16.vlgmr.msra.gmra.mxu1 %vm36_vm2, %v485_v15 }
  0x17   :  { %550 = vmatpush3.bf16.msra.mxu0 %v322_v16  ;;  %556 = vmatpush3.bf16.msra.mxu1 %v135_v6 }
  0x18   :  { %551 = vmatprep.mubr.msk.bf16.mxu0 %vm580_vm1, %v579_v0  ;;  %557 = vmatprep.mubr.msk.bf16.mxu1 %vm580_vm1, %v579_v0 }
  0x19   :  { %561 = vmatprep.subr.bf16.mxu0 %v579_v0 }
  0x1e   :  { %552 = vmatmul.mubr.msk.bf16.vlgmr.msra.gmra.mxu0 %vm36_vm2, %v272_v17  ;;  %558 = vmatmul.mubr.msk.bf16.vlgmr.msra.gmra.mxu1 %vm36_vm2, %v488_v18 }
  0x1f   :  { %562 = vmatpush3.bf16.msra.mxu0 %v42_v2  ;;  %563 = vmatprep.mubr.msk.bf16.mxu0 %vm580_vm1, %v579_v0 }
  0x26   :  { %564 = vmatmul.mubr.msk.bf16.vlgmr.msra.gmra.mxu0 %vm36_vm2, %v490_v19 }
  0x85   :  { %v34_v20 = vpop.permute.xlu0 %33 }
  0xc6   :  { %v78_v21 = vpop.f32.mrf.mxu0  ;;  %v125_v22 = vpop.f32.mrf.mxu1 }
  0xc7   :  { %v79_v23 = vadd.f32 %v78_v21, %v34_v20 }
  0xc8   :  { %v517_v24 = vpop.f32.mrf.mxu0  ;;  %v523_v25 = vpop.f32.mrf.mxu1 }
  0xc9   :  { %571 = vtanh.f32 %v79_v23 }
  0xca   :  { %v81_v26 = vpop.f32.mrf.mxu0  ;;  %v128_v27 = vpop.f32.mrf.mxu1 }
  0xcc   :  { %v518_v28 = vpop.f32.mrf.mxu0  ;;  %v524_v29 = vpop.f32.mrf.mxu1 }
  0xce   :  { %v171_v30 = vpop.f32.mrf.mxu0  ;;  %v219_v31 = vpop.f32.mrf.mxu1 }
  0xcf   :  { %v172_v32 = vadd.f32 %v171_v30, %v125_v22 }
  0xd0   :  { %v529_v33 = vpop.f32.mrf.mxu0  ;;  %v535_v34 = vpop.f32.mrf.mxu1 }
  0xd1   :  { %v177_v35 = vadd.f32 %v172_v32, %v34_v20 }
  0xd2   :  { %v174_v36 = vpop.f32.mrf.mxu0  ;;  %v222_v37 = vpop.f32.mrf.mxu1 }
  0xd3   :  { %573 = vtanh.f32 %v177_v35 }
  0xd4   :  { %v530_v38 = vpop.f32.mrf.mxu0  ;;  %v536_v39 = vpop.f32.mrf.mxu1 }
  0xd6   :  { %v572_v40 = vpop.eup %571  ;;  %v265_v41 = vpop.f32.mrf.mxu0 }
  0xd7   :  { %v312_v42 = vpop.f32.mrf.mxu1  ;;  %458 = vst [vmem:[%s693_s5] sm:$0xf] %v572_v40  ;;  %v266_v43 = vadd.f32 %v265_v41, %v219_v31 }
  0xd8   :  { %v541_v44 = vpop.f32.mrf.mxu0 }
  0xd9   :  { %v547_v45 = vpop.f32.mrf.mxu1  ;;  %v271_v46 = vadd.f32 %v266_v43, %v34_v20 }
  0xda   :  { %v268_v47 = vpop.f32.mrf.mxu0 }
  0xdb   :  { %v315_v48 = vpop.f32.mrf.mxu1  ;;  %575 = vtanh.f32 %v271_v46 }
  0xdc   :  { %v542_v49 = vpop.f32.mrf.mxu0 }
  0xdd   :  { %v548_v50 = vpop.f32.mrf.mxu1 }
  0xde   :  { %v358_v51 = vpop.f32.mrf.mxu0 }
  0xdf   :  { %v403_v52 = vpop.f32.mrf.mxu1  ;;  %v359_v56 = vadd.f32 %v358_v51, %v312_v42 }
  0xe0   :  { %v574_v53 = vpop.eup %573  ;;  %v553_v54 = vpop.f32.mrf.mxu0 }
  0xe1   :  { %v559_v55 = vpop.f32.mrf.mxu1  ;;  %492 = vst [vmem:[%s693_s5 + $0x4] sm:$0xf] %v574_v53  ;;  %v409_v61 = vadd.f32 %v403_v52, %v359_v56 }
  0xe2   :  { %v361_v57 = vpop.f32.mrf.mxu0 }
  0xe3   :  { %v406_v58 = vpop.f32.mrf.mxu1 }
  0xe4   :  { %v554_v59 = vpop.f32.mrf.mxu0 }
  0xe5   :  { %v560_v60 = vpop.f32.mrf.mxu1 }
  0xe6   :  { %v449_v62 = vpop.f32.mrf.mxu0 }
  0xe7   :  { %v455_v63 = vadd.f32 %v449_v62, %v409_v61 }
  0xe8   :  { %v576_v0 = vpop.eup %575  ;;  %v565_v1 = vpop.f32.mrf.mxu0 }
  0xe9   :  { %493 = vst [vmem:[%s693_s5 + $0x8] sm:$0xf] %v576_v0  ;;  %v456_v2 = vadd.f32 %v455_v63, %v34_v20 }
  0xea   :  { %v452_v3 = vpop.f32.mrf.mxu0 }
  0xeb   :  { %577 = vtanh.f32 %v456_v2 }
  0xec   :  { %v566_v4 = vpop.f32.mrf.mxu0 }
  0xf8   :  { %v578_v5 = vpop.eup %577 }
  0xf9   :  { %494 = vst [vmem:[%s693_s5 + $0xc] sm:$0xf] %v578_v5 }

// kernel: fwd.10
= control target key start
LH: loop header
LB: loop body
LE: loop exit
PB: predicated region body
PF: predicated region fallthrough
CT: control target
= control target key end

     0   :  { %v672_v0 = vmov 0.0   ;;  %vm673_vm0 = vmmov 0   ;;  %vm46_vm1 = vcmask 130048   ;;  %v674_v5 = vmov 0   ;;  %s795_s0 = inlined_call_operand.vmem [shape: bf16[4,16,32], index: 0, kind: input, shape index: {}]   ;;  %s796_s1 = inlined_call_operand.vmem [shape: bf16[9,8,16], index: 1, kind: input, shape index: {}]   ;;  %s797_s2 = inlined_call_operand.vmem [shape: f32[8,1], index: 2, kind: input, shape index: {}]   ;;  %s798_s4 = inlined_call_operand.vmem [shape: f32[8,1], index: 4, kind: input, shape index: {}]   ;;  %s799_s3 = inlined_call_operand.vmem [shape: f32[8,1], index: 3, kind: input, shape index: {}]   ;;  %s800_s5 = inlined_call_operand.vmem [shape: f32[4,8,32], index: 5, kind: output, shape index: {}]  }
   0x1   :  { %607 = vmatprep.subr.bf16.mxu0 %v672_v0  ;;  %v666_v1 = vld [vmem:[%s795_s0] sm:$0xff]   ;;  %613 = vmatprep.subr.bf16.mxu1 %v672_v0  ;;  %v565_v2 = vld [vmem:[%s796_s1 + $0x10] sm:$0xf]  ;;  %v569_v3 = vld [vmem:[%s796_s1 + $0x14] sm:$0xf]  ;;  %vm472_vm2 = vcmask 261120  }
   0x2   :  { %609 = vmatprep.mubr.msk.bf16.mxu0 %vm673_vm0, %v672_v0  ;;  %615 = vmatprep.mubr.msk.bf16.mxu1 %vm673_vm0, %v672_v0  ;;  %v667_v4 = vld [vmem:[%s795_s0 + $0x8] sm:$0xff]   ;;  %v32_v6 = vld [vmem:[%s797_s2] sm:$0xff]  ;;  %v574_v8 = vld [vmem:[%s796_s1 + $0x1c] sm:$0xf] }
   0x3   :  { %608 = vmatpush3.bf16.msra.mxu0 %v666_v1  ;;  %614 = vmatpush3.bf16.msra.mxu1 %v666_v1  ;;  %v568_v7 = vld [vmem:[%s796_s1 + $0xc] sm:$0xf]  ;;  %v668_v9 = vld [vmem:[%s795_s0 + $0x10] sm:$0xff]   ;;  %v573_v10 = vld [vmem:[%s796_s1 + $0x4] sm:$0xf] }
   0x4   :  { %619 = vmatprep.subr.bf16.mxu0 %v672_v0  ;;  %625 = vmatprep.subr.bf16.mxu1 %v672_v0  ;;  %v578_v11 = vld [vmem:[%s796_s1 + $0x8] sm:$0xf]  ;;  %v669_v12 = vld [vmem:[%s795_s0 + $0x18] sm:$0xff]   ;;  %v284_v13 = vld [vmem:[%s796_s1] sm:$0xf] }
   0x5   :  { %664 = vset.pattern.permute.xlu0 %v674_v5  ;;  %665 = vset.pattern.permute.xlu1 %v674_v5  ;;  %v582_v14 = vld [vmem:[%s796_s1 + $0x18] sm:$0xf]  ;;  %v584_v15 = vld [vmem:[%s796_s1 + $0x20] sm:$0xf] }
   0x6   :  { %610 = vmatmul.mubr.msk.bf16.vlgmr.msra.gmra.mxu0 %vm46_vm1, %v565_v2  ;;  %616 = vmatmul.mubr.msk.bf16.vlgmr.msra.gmra.mxu1 %vm46_vm1, %v569_v3  ;;  %v517_v49 = vld [vmem:[%s798_s4] sm:$0xff] }
   0x7   :  { %620 = vmatpush3.bf16.msra.mxu0 %v667_v4  ;;  %626 = vmatpush3.bf16.msra.mxu1 %v666_v1 }
   0x8   :  { %621 = vmatprep.mubr.msk.bf16.mxu0 %vm673_vm0, %v672_v0  ;;  %627 = vmatprep.mubr.msk.bf16.mxu1 %vm673_vm0, %v672_v0 }
   0x9   :  { %631 = vmatprep.subr.bf16.mxu0 %v672_v0  ;;  %637 = vmatprep.subr.bf16.mxu1 %v672_v0 }
   0xa   :  { %37 = vperm.xlu0 %664, %v32_v6  }
   0xe   :  { %622 = vmatmul.mubr.msk.bf16.vlgmr.msra.gmra.mxu0 %vm46_vm1, %v568_v7  ;;  %628 = vmatmul.mubr.msk.bf16.vlgmr.msra.gmra.mxu1 %vm46_vm1, %v574_v8 }
   0xf   :  { %632 = vmatpush3.bf16.msra.mxu0 %v668_v9  ;;  %638 = vmatpush3.bf16.msra.mxu1 %v668_v9 }
  0x10   :  { %633 = vmatprep.mubr.msk.bf16.mxu0 %vm673_vm0, %v672_v0  ;;  %639 = vmatprep.mubr.msk.bf16.mxu1 %vm673_vm0, %v672_v0 }
  0x11   :  { %643 = vmatprep.subr.bf16.mxu0 %v672_v0  ;;  %649 = vmatprep.subr.bf16.mxu1 %v672_v0 }
  0x16   :  { %634 = vmatmul.mubr.msk.bf16.vlgmr.msra.gmra.mxu0 %vm46_vm1, %v573_v10  ;;  %640 = vmatmul.mubr.msk.bf16.vlgmr.msra.gmra.mxu1 %vm46_vm1, %v578_v11 }
  0x17   :  { %644 = vmatpush3.bf16.msra.mxu0 %v669_v12  ;;  %650 = vmatpush3.bf16.msra.mxu1 %v667_v4 }
  0x18   :  { %645 = vmatprep.mubr.msk.bf16.mxu0 %vm673_vm0, %v672_v0  ;;  %651 = vmatprep.mubr.msk.bf16.mxu1 %vm673_vm0, %v672_v0 }
  0x19   :  { %655 = vmatprep.subr.bf16.mxu0 %v672_v0 }
  0x1e   :  { %646 = vmatmul.mubr.msk.bf16.vlgmr.msra.gmra.mxu0 %vm46_vm1, %v284_v13  ;;  %652 = vmatmul.mubr.msk.bf16.vlgmr.msra.gmra.mxu1 %vm46_vm1, %v582_v14 }
  0x1f   :  { %656 = vmatpush3.bf16.msra.mxu0 %v666_v1  ;;  %657 = vmatprep.mubr.msk.bf16.mxu0 %vm673_vm0, %v672_v0 }
  0x26   :  { %658 = vmatmul.mubr.msk.bf16.vlgmr.msra.gmra.mxu0 %vm46_vm1, %v584_v15 }
  0x85   :  { %v38_v16 = vpop.permute.xlu0 %37 }
  0xc6   :  { %v84_v17 = vpop.f32.mrf.mxu0  ;;  %v131_v18 = vpop.f32.mrf.mxu1 }
  0xc7   :  { %v85_v19 = vadd.f32 %v84_v17, %v38_v16 }
  0xc8   :  { %v611_v20 = vpop.f32.mrf.mxu0  ;;  %v617_v21 = vpop.f32.mrf.mxu1 }
  0xc9   :  { %v473_v22 = vsel %vm472_vm2, %v85_v19, 0.0 }
  0xca   :  { %474 = vadd.xlane.f32.xlu0 %v473_v22  ;;  %v87_v23 = vpop.f32.mrf.mxu0  ;;  %v134_v24 = vpop.f32.mrf.mxu1 }
  0xcc   :  { %v612_v25 = vpop.f32.mrf.mxu0  ;;  %v618_v26 = vpop.f32.mrf.mxu1 }
  0xce   :  { %v180_v27 = vpop.f32.mrf.mxu0  ;;  %v228_v28 = vpop.f32.mrf.mxu1 }
  0xcf   :  { %v181_v29 = vadd.f32 %v180_v27, %v131_v18 }
  0xd0   :  { %v623_v30 = vpop.f32.mrf.mxu0  ;;  %v629_v31 = vpop.f32.mrf.mxu1 }
  0xd1   :  { %v186_v32 = vadd.f32 %v181_v29, %v38_v16 }
  0xd2   :  { %v183_v33 = vpop.f32.mrf.mxu0  ;;  %v231_v34 = vpop.f32.mrf.mxu1 }
  0xd3   :  { %v476_v35 = vsel %vm472_vm2, %v186_v32, 0.0 }
  0xd4   :  { %477 = vadd.xlane.f32.xlu1 %v476_v35  ;;  %v624_v36 = vpop.f32.mrf.mxu0  ;;  %v630_v37 = vpop.f32.mrf.mxu1 }
  0xd6   :  { %v277_v38 = vpop.f32.mrf.mxu0  ;;  %v324_v39 = vpop.f32.mrf.mxu1 }
  0xd7   :  { %v278_v40 = vadd.f32 %v277_v38, %v228_v28 }
  0xd8   :  { %v635_v41 = vpop.f32.mrf.mxu0  ;;  %v641_v42 = vpop.f32.mrf.mxu1 }
  0xd9   :  { %v283_v43 = vadd.f32 %v278_v40, %v38_v16 }
  0xda   :  { %v280_v44 = vpop.f32.mrf.mxu0  ;;  %v327_v45 = vpop.f32.mrf.mxu1 }
  0xdb   :  { %v480_v46 = vsel %vm472_vm2, %v283_v43, 0.0 }
  0xdc   :  { %481 = vadd.xlane.f32.xlu1 %v480_v46  ;;  %v636_v47 = vpop.f32.mrf.mxu0  ;;  %v642_v48 = vpop.f32.mrf.mxu1 }
  0xde   :  { %v373_v50 = vpop.f32.mrf.mxu0  ;;  %v418_v51 = vpop.f32.mrf.mxu1 }
  0xdf   :  { %v374_v54 = vadd.f32 %v373_v50, %v324_v39 }
  0xe0   :  { %526 = vperm.xlu0 %664, %v517_v49   ;;  %v647_v52 = vpop.f32.mrf.mxu0  ;;  %v653_v53 = vpop.f32.mrf.mxu1 }
  0xe1   :  { %v424_v59 = vadd.f32 %v418_v51, %v374_v54 }
  0xe2   :  { %v376_v55 = vpop.f32.mrf.mxu0  ;;  %v421_v56 = vpop.f32.mrf.mxu1 }
  0xe4   :  { %v648_v57 = vpop.f32.mrf.mxu0  ;;  %v654_v58 = vpop.f32.mrf.mxu1 }
  0xe6   :  { %v464_v60 = vpop.f32.mrf.mxu0 }
  0xe7   :  { %v470_v61 = vadd.f32 %v464_v60, %v424_v59 }
  0xe8   :  { %v659_v62 = vpop.f32.mrf.mxu0 }
  0xe9   :  { %v471_v63 = vadd.f32 %v470_v61, %v38_v16 }
  0xea   :  { %v467_v0 = vpop.f32.mrf.mxu0 }
  0xeb   :  { %v484_v1 = vsel %vm472_vm2, %v471_v63, 0.0 }
  0xec   :  { %485 = vadd.xlane.f32.xlu1 %v484_v1  ;;  %v660_v2 = vpop.f32.mrf.mxu0 }
 0x153   :  { %v475_v4 = vpop.xlane.xlu0 %474 }
 0x15b   :  { %v527_v40 = vpop.permute.xlu0 %526 }
 0x15d   :  { %v478_v3 = vpop.xlane.xlu1 %477 }
 0x15e   :  { %v479_v6 = vadd.f32 %v478_v3, %v475_v4 }
 0x165   :  { %v482_v5 = vpop.xlane.xlu1 %481 }
 0x166   :  { %v483_v7 = vadd.f32 %v482_v5, %v479_v6 }
 0x175   :  { %v486_v8 = vpop.xlane.xlu1 %485 }
 0x176   :  { %v487_v9 = vadd.f32 %v486_v8, %v483_v7 }
 0x178   :  { %v488_v10 = vmul.f32 0.0078125, %v487_v9 }
 0x17a   :  { %v489_v11 = vsub.f32 %v85_v19, %v488_v10  ;;  %v490_v12 = vsub.f32 %v186_v32, %v488_v10  ;;  %v491_v16 = vsub.f32 %v283_v43, %v488_v10  ;;  %v492_v20 = vsub.f32 %v471_v63, %v488_v10  ;;  %v515_v32 = vld [vmem:[%s799_s3] sm:$0xff] }
 0x17c   :  { %v493_v13 = vmul.f32 %v489_v11, %v489_v11  ;;  %v497_v15 = vmul.f32 %v490_v12, %v490_v12  ;;  %v502_v18 = vmul.f32 %v491_v16, %v491_v16  ;;  %v507_v22 = vmul.f32 %v492_v20, %v492_v20 }
 0x17e   :  { %v494_v14 = vsel %vm472_vm2, %v493_v13, 0.0  ;;  %v498_v17 = vsel %vm472_vm2, %v497_v15, 0.0  ;;  %v503_v21 = vsel %vm472_vm2, %v502_v18, 0.0  ;;  %v508_v23 = vsel %vm472_vm2, %v507_v22, 0.0 }
 0x17f   :  { %495 = vadd.xlane.f32.xlu1 %v494_v14 }
 0x183   :  { %499 = vadd.xlane.f32.xlu1 %v498_v17 }
 0x187   :  { %504 = vadd.xlane.f32.xlu1 %v503_v21 }
 0x18b   :  { %509 = vadd.xlane.f32.xlu1 %v508_v23 }
 0x208   :  { %v496_v19 = vpop.xlane.xlu1 %495 }
 0x20c   :  { %v500_v24 = vpop.xlane.xlu1 %499 }
 0x20d   :  { %v501_v26 = vadd.f32 %v500_v24, %v496_v19 }
 0x210   :  { %v505_v25 = vpop.xlane.xlu1 %504 }
 0x211   :  { %v506_v27 = vadd.f32 %v505_v25, %v501_v26 }
 0x214   :  { %v510_v28 = vpop.xlane.xlu1 %509 }
 0x215   :  { %v511_v29 = vadd.f32 %v510_v28, %v506_v27 }
 0x217   :  { %v512_v30 = vmul.f32 0.0078125, %v511_v29 }
 0x219   :  { %v513_v31 = vadd.f32 1e-05, %v512_v30 }
 0x21b   :  { %670 = vrsqrt.f32 %v513_v31 }
 0x228   :  { %v671_v33 = vpop.eup %670 }
 0x229   :  { %v516_v34 = vmul.f32 %v671_v33, %v515_v32 }
 0x22b   :  { %520 = vperm.xlu1 %665, %v516_v34  }
 0x2a6   :  { %v521_v35 = vpop.permute.xlu1 %520 }
 0x2a7   :  { %v523_v36 = vmul.f32 %v521_v35, %v489_v11  ;;  %v534_v37 = vmul.f32 %v521_v35, %v490_v12  ;;  %v541_v38 = vmul.f32 %v521_v35, %v491_v16  ;;  %v548_v39 = vmul.f32 %v521_v35, %v492_v20 }
 0x2a9   :  { %v529_v41 = vadd.f32 %v527_v40, %v523_v36  ;;  %v535_v42 = vadd.f32 %v534_v37, %v527_v40  ;;  %v542_v43 = vadd.f32 %v541_v38, %v527_v40  ;;  %v549_v44 = vadd.f32 %v548_v39, %v527_v40 }
 0x2ab   :  { %vm530_vm3 = vcmp.ge.f32.partialorder %v529_v41, 0.0  ;;  %v531_v45 = vmul.f32 0.01, %v529_v41  ;;  %vm536_vm4 = vcmp.ge.f32.partialorder %v535_v42, 0.0  ;;  %v537_v46 = vmul.f32 0.01, %v535_v42 }
 0x2ac   :  { %vm543_vm5 = vcmp.ge.f32.partialorder %v542_v43, 0.0  ;;  %v544_v47 = vmul.f32 0.01, %v542_v43  ;;  %vm550_vm6 = vcmp.ge.f32.partialorder %v549_v44, 0.0  ;;  %v551_v48 = vmul.f32 0.01, %v549_v44 }
 0x2ad   :  { %v532_v49 = vsel %vm530_vm3, %v529_v41, %v531_v45  ;;  %v538_v50 = vsel %vm536_vm4, %v535_v42, %v537_v46 }
 0x2ae   :  { %533 = vst.msk [vmem:[%s800_s5] sm:$0xff] %vm472_vm2, %v532_v49  ;;  %586 = vst.msk [vmem:[%s800_s5 + $0x8] sm:$0xff] %vm472_vm2, %v538_v50  ;;  %v545_v51 = vsel %vm543_vm5, %v542_v43, %v544_v47  ;;  %v552_v52 = vsel %vm550_vm6, %v549_v44, %v551_v48 }
 0x2af   :  { %587 = vst.msk [vmem:[%s800_s5 + $0x10] sm:$0xff] %vm472_vm2, %v545_v51  ;;  %588 = vst.msk [vmem:[%s800_s5 + $0x18] sm:$0xff] %vm472_vm2, %v552_v52 }

</bundles_post_ra>
